<compile_context>
chip_gen: v7x
topology: tpu7x:2x2x1
jax: 0.10.0
libtpu: 0.0.40
codegen_flags: <defaults>
</compile_context>

<pallas_src>
import jax
import jax.numpy as jnp
from jax import lax
from jax.experimental import pallas as pl
from jax.experimental.pallas import tpu as pltpu


# ----------------------------------------------------------------------------
# Fused kernel: conv(x) + upsample(conv(maxpool(x))) + 2*bias + ReLU, B images/step
# ----------------------------------------------------------------------------
def make_fused_kernel(B, H, W, C):
    BH = B * H
    WC = W * C

    def kernel(x_ref, mA_ref, mB_ref, b2_ref, o_ref):
        # x_ref : (B*H, W*C)   f32   B images stacked along rows (matmul M dim)
        # mA_ref: (W*C, 3*W*C) bf16  [band(dh=0) | band(dh=1) | band(dh=2)] full-res branch
        # mB_ref: (W*C, 3*W*C) bf16  pooled branch (lane compaction + W-upsample folded in)
        # b2_ref: (1, W*C)     f32   2 * bias, tiled along W (shared by both branches)
        # o_ref : (B*H, W*C)
        x = x_ref[...]
        rows = lax.broadcasted_iota(jnp.int32, (BH, WC), 0)
        h = rows % H                                   # per-image row index (image seams!)
        x_bf = x.astype(jnp.bfloat16)

        # ---------------- branch A: 3x3 conv on full resolution ----------------
        vA = jnp.dot(x_bf, mA_ref[...], preferred_element_type=jnp.float32)   # (BH, 3*WC)
        v0, v1, v2 = vA[:, :WC], vA[:, WC:2 * WC], vA[:, 2 * WC:]
        # vertical taps: output row h takes v0[h-1], v1[h], v2[h+1] (zero H-padding,
        # masked per image so rolls never leak across image boundaries)
        top = jnp.where(h < 1, 0.0, pltpu.roll(v0, 1, axis=0))
        bot = jnp.where(h >= H - 1, 0.0, pltpu.roll(v2, BH - 1, axis=0))
        yA = v1 + top + bot

        # ------- branch B: 2x2 maxpool -> 3x3 conv -> nearest upsample x2 -------
        # pairwise maxes in f32; pooled value (i, j, c) lands at row 2i, lane 2*C*j + c.
        # Roll wraparounds only contaminate rows/lanes that mB's zero rows and the
        # even-row path never consume.
        q = jnp.maximum(x, pltpu.roll(x, BH - 1, axis=0))        # row pair (h, h+1)
        r = jnp.maximum(q, pltpu.roll(q, WC - C, axis=1))        # W pair (2j, 2j+1)
        uB = jnp.dot(r.astype(jnp.bfloat16), mB_ref[...],
                     preferred_element_type=jnp.float32)         # (BH, 3*WC)
        u0, u1, u2 = uB[:, :WC], uB[:, WC:2 * WC], uB[:, 2 * WC:]
        topB = jnp.where(h < 2, 0.0, pltpu.roll(u0, 2, axis=0))
        botB = jnp.where(h >= H - 2, 0.0, pltpu.roll(u2, BH - 2, axis=0))
        yB = u1 + topB + botB                                    # valid on even rows only
        # H-direction nearest upsample: odd rows copy the even row above (same image).
        odd = (h & 1) == 1
        yB_up = jnp.where(odd, pltpu.roll(yB, 1, axis=0), yB)

        o_ref[...] = jnp.maximum(yA + yB_up + b2_ref[...], 0.0).astype(o_ref.dtype)

    return kernel


def birepvgg_forward(x_flat, mA, mB, bias2_row, *, H, W, C, images_per_block=8):
    """Fused BiRepVGG forward.

    x_flat   : (N, H, W*C) f32, NHWC flattened to lane-dense (H, W*C) per image.
    mA, mB   : (W*C, 3*W*C) bf16 resident weight matrices (build_fused_weights).
    bias2_row: (1, W*C) f32, 2 * bias tiled along W.
    returns  : (N, H, W*C) f32.
    """
    N = x_flat.shape[0]
    WC = W * C
    B = max(1, min(images_per_block, N))
    n_blocks = pl.cdiv(N, B)
    Npad = n_blocks * B

    x2d = x_flat.reshape(N * H, WC)
    if Npad != N:
        # padded garbage images are computed and discarded; image seams stay correct
        x2d = jnp.pad(x2d, ((0, (Npad - N) * H), (0, 0)))

    out2d = pl.pallas_call(
        make_fused_kernel(B, H, W, C),
        out_shape=jax.ShapeDtypeStruct((Npad * H, WC), x_flat.dtype),
        grid_spec=pltpu.PrefetchScalarGridSpec(
            num_scalar_prefetch=0,
            grid=(n_blocks,),
            in_specs=[
                pl.BlockSpec((B * H, WC), lambda n: (n, 0)),
                pl.BlockSpec(mA.shape, lambda n: (0, 0)),   # resident weights (bf16)
                pl.BlockSpec(mB.shape, lambda n: (0, 0)),   # resident weights (bf16)
                pl.BlockSpec((1, WC), lambda n: (0, 0)),    # resident 2*bias
            ],
            out_specs=pl.BlockSpec((B * H, WC), lambda n: (n, 0)),
        ),
        compiler_params=pltpu.CompilerParams(dimension_semantics=("parallel",)),
    )(x2d, mA, mB, bias2_row)

    return out2d[: N * H].reshape(N, H, WC)


# ----------------------------------------------------------------------------
# Host-side (one-time) weight preparation: banded row-matmul matrices
# ----------------------------------------------------------------------------
def _band_from_taps(k_dh, Wd):
    """k_dh: (3, Cin, Cout) taps for a fixed dh -> (Wd*Cin, Wd*Cout) banded matrix mapping
    a flattened image row to its conv contribution (W-direction zero-padding folded in)."""
    Cin, Cout = k_dh.shape[1], k_dh.shape[2]
    w_in = jnp.arange(Wd)[:, None]
    w_out = jnp.arange(Wd)[None, :]
    dw = w_in - w_out + 1
    valid = (dw >= 0) & (dw <= 2)
    blocks = k_dh[jnp.clip(dw, 0, 2)]                       # (Wd, Wd, Cin, Cout)
    blocks = jnp.where(valid[:, :, None, None], blocks, 0.0)
    return jnp.transpose(blocks, (0, 2, 1, 3)).reshape(Wd * Cin, Wd * Cout)


def build_fused_weights(w_hwio, bias, H, W):
    """Build the kernel's resident operands from the fused RepVGG 3x3 kernel + bias."""
    Cin, Cout = w_hwio.shape[2], w_hwio.shape[3]
    assert Cin == Cout, "fused path assumes in_channels == out_channels"
    assert H % 2 == 0 and W % 2 == 0
    W2 = W // 2
    # branch A: concat the three per-dh banded matrices along output columns -> (WC, 3*WC)
    mA = jnp.concatenate([_band_from_taps(w_hwio[dh], W) for dh in range(3)], axis=1)
    # branch B: zero rows for the pooled pair-partner lanes, duplicated output columns
    # (= nearest W-upsample folded into the matrix), concatenated over dh -> (WC, 3*WC)
    mBs = []
    for dh in range(3):
        Mc = _band_from_taps(w_hwio[dh], W2).reshape(W2, Cin, W2, Cout)
        Min = jnp.concatenate([Mc, jnp.zeros_like(Mc)], axis=1)   # (W2, 2Cin, W2, Cout)
        Mup = jnp.concatenate([Min, Min], axis=3)                 # (W2, 2Cin, W2, 2Cout)
        mBs.append(Mup.reshape(W2 * 2 * Cin, W2 * 2 * Cout))
    mB = jnp.concatenate(mBs, axis=1)
    # single fused bias: both branches add the same bias; the nearest-upsample preserves it
    bias2_row = (2.0 * jnp.tile(bias, W)).reshape(1, W * Cout).astype(jnp.float32)
    return mA.astype(jnp.bfloat16), mB.astype(jnp.bfloat16), bias2_row


# ----------------------------------------------------------------------------
# Parameter setup + RepVGG BN-fusion (matches RepVGG_Module.get_equivalent_kernel_bias)
# ----------------------------------------------------------------------------
def _init_bn(key, c):
    k1, k2, k3, k4 = jax.random.split(key, 4)
    return dict(gamma=1.0 + 0.1 * jax.random.normal(k1, (c,), jnp.float32),
                beta=0.1 * jax.random.normal(k2, (c,), jnp.float32),
                mean=0.1 * jax.random.normal(k3, (c,), jnp.float32),
                var=jax.random.uniform(k4, (c,), jnp.float32, 0.5, 1.5),
                eps=1e-5)


def init_repvgg_params(key, cin, cout):
    ks = jax.random.split(key, 5)
    return dict(
        w3=0.1 * jax.random.normal(ks[0], (cout, cin, 3, 3), jnp.float32),
        bn3=_init_bn(ks[1], cout),
        w1=0.1 * jax.random.normal(ks[2], (cout, cin, 1, 1), jnp.float32),
        bn1=_init_bn(ks[3], cout),
        bni=_init_bn(ks[4], cout) if cin == cout else None,
    )


def _fuse_bn(w_oihw, bn):
    std = jnp.sqrt(bn['var'] + bn['eps'])
    t = bn['gamma'] / std
    return w_oihw * t[:, None, None, None], bn['beta'] - bn['mean'] * t


def repvgg_equivalent_kernel(p, cin, cout):
    k3, b3 = _fuse_bn(p['w3'], p['bn3'])
    k1, b1 = _fuse_bn(p['w1'], p['bn1'])
    ker = k3 + jnp.pad(k1, ((0, 0), (0, 0), (1, 1), (1, 1)))
    bias = b3 + b1
    if p['bni'] is not None:
        idk = jnp.zeros((cout, cin, 3, 3), jnp.float32)
        idk = idk.at[jnp.arange(cin), jnp.arange(cin), 1, 1].set(1.0)
        ki, bi = _fuse_bn(idk, p['bni'])
        ker = ker + ki
        bias = bias + bi
    w_hwio = jnp.transpose(ker, (2, 3, 1, 0))  # OIHW -> HWIO
    return w_hwio, bias


# ----------------------------------------------------------------------------
# Pure-JAX reference (bf16-matched at the conv boundary, like the kernel)
# ----------------------------------------------------------------------------
def birepvgg_ref_nhwc(x_nhwc, w_rep, b_rep):
    wb = w_rep.astype(jnp.bfloat16)

    def conv(z):
        y = lax.conv_general_dilated(z.astype(jnp.bfloat16), wb, (1, 1), 'SAME',
                                     dimension_numbers=('NHWC', 'HWIO', 'NHWC'),
                                     preferred_element_type=jnp.float32)
        return y + b_rep

    N, H, W, C = x_nhwc.shape
    yA = conv(x_nhwc)
    x2 = jnp.max(x_nhwc.reshape(N, H // 2, 2, W // 2, 2, C), axis=(2, 4))
    yB = conv(x2)
    Co = yB.shape[-1]
    yB_up = jnp.broadcast_to(yB[:, :, None, :, None, :],
                             (N, H // 2, 2, W // 2, 2, Co)).reshape(N, H, W, Co)
    return jnp.maximum(yA + yB_up, 0.0)


if __name__ == "__main__":
    key = jax.random.PRNGKey(0)
    kx, kp1, kp2 = jax.random.split(key, 3)

    # fwd_size == (16, 8) path; in_channels == out_channels so the identity BN branch exists
    N, C, Himg, Wimg = 16, 8, 16, 16
    IMAGES_PER_BLOCK = 8          # M = 8*16 = 128 rows/step, grid = 2 -> both v7x TCs busy

    x_nchw = jax.random.normal(kx, (N, C, Himg, Wimg), jnp.float32)
    # The kernel entry point takes the lane-dense (N, H, W*C) layout directly; this
    # transpose is demo-harness glue only (a surrounding NHWC model would skip it).
    x_nhwc = jnp.transpose(x_nchw, (0, 2, 3, 1))
    x_flat = x_nhwc.reshape(N, Himg, Wimg * C)

    # br1 params (used on both sub-branches of the fwd_size==(16,8) path)
    p_br1 = init_repvgg_params(kp1, C, C)
    w_rep, b_rep = repvgg_equivalent_kernel(p_br1, C, C)
    # br2 params exist in the PyTorch module but are unused on this forward path
    _p_br2 = init_repvgg_params(kp2, C, C)

    mA, mB, bias2_row = build_fused_weights(w_rep, b_rep, Himg, Wimg)

    fwd = jax.jit(lambda xf, a, b, bb: birepvgg_forward(
        xf, a, b, bb, H=Himg, W=Wimg, C=C, images_per_block=IMAGES_PER_BLOCK))
    out_flat = jax.block_until_ready(fwd(x_flat, mA, mB, bias2_row))

    out_nhwc = out_flat.reshape(N, Himg, Wimg, C)
    ref_nhwc = jax.block_until_ready(birepvgg_ref_nhwc(x_nhwc, w_rep, b_rep))

    assert out_nhwc.shape == (N, Himg, Wimg, C)
    if not jnp.allclose(out_nhwc, ref_nhwc, atol=1e-2, rtol=1e-2):
        err = float(jnp.max(jnp.abs(out_nhwc - ref_nhwc)))
        raise AssertionError(f"Pallas result does not match reference (max abs err {err})")
    print("KERNEL_OK")
</pallas_src>

<mosaic_0001>
module attributes {stable_mosaic.version = 11 : i64} {
  func.func @kernel(%arg0: i32, %arg1: memref<128x128xf32, #tpu.memory_space<vmem>>, %arg2: memref<128x384xbf16, #tpu.memory_space<vmem>>, %arg3: memref<128x384xbf16, #tpu.memory_space<vmem>>, %arg4: memref<1x128xf32, #tpu.memory_space<vmem>>, %arg5: memref<128x128xf32, #tpu.memory_space<vmem>>) attributes {dimension_semantics = [#tpu.dimension_semantics<parallel>], iteration_bounds = array<i64: 2>, scalar_prefetch = 0 : i64, scratch_operands = 0 : i64, tpu.core_type = #tpu.core_type<tc>, window_params = [{transform_indices = @transform_0, window_bounds = array<i64: 128, 128>}, {pipeline_mode = #tpu.pipeline_mode<synchronous>, transform_indices = @transform_1, window_bounds = array<i64: 128, 384>}, {pipeline_mode = #tpu.pipeline_mode<synchronous>, transform_indices = @transform_2, window_bounds = array<i64: 128, 384>}, {pipeline_mode = #tpu.pipeline_mode<synchronous>, transform_indices = @transform_3, window_bounds = array<i64: 1, 128>}, {transform_indices = @transform_4, window_bounds = array<i64: 128, 128>}]} {
    %c0 = arith.constant 0 : index
    %c0_0 = arith.constant 0 : index
    %0 = vector.load %arg1[%c0, %c0_0] : memref<128x128xf32, #tpu.memory_space<vmem>>, vector<128x128xf32>
    %1 = tpu.iota {dimensions = array<i32: 0>} : vector<128x128xi32>
    %c16_i32 = arith.constant 16 : i32
    %c0_i32 = arith.constant 0 : i32
    %2 = arith.cmpi eq, %c16_i32, %c0_i32 : i32
    %c1_i32 = arith.constant 1 : i32
    %3 = arith.select %2, %c1_i32, %c16_i32 : i32
    %4 = vector.broadcast %3 : i32 to vector<128x128xi32>
    %5 = arith.remsi %1, %4 : vector<128x128xi32>
    %c0_i32_1 = arith.constant 0 : i32
    %6 = vector.broadcast %c0_i32_1 : i32 to vector<128x128xi32>
    %7 = arith.cmpi ne, %5, %6 : vector<128x128xi32>
    %c0_i32_2 = arith.constant 0 : i32
    %8 = vector.broadcast %c0_i32_2 : i32 to vector<128x128xi32>
    %9 = arith.cmpi slt, %5, %8 : vector<128x128xi32>
    %c0_i32_3 = arith.constant 0 : i32
    %10 = arith.cmpi slt, %3, %c0_i32_3 : i32
    %11 = vector.broadcast %10 : i1 to vector<128x128xi1>
    %12 = vector.broadcast %11 : vector<128x128xi1> to vector<128x128xi1>
    %13 = arith.xori %9, %12 : vector<128x128xi1>
    %14 = arith.andi %13, %7 : vector<128x128xi1>
    %15 = vector.broadcast %3 : i32 to vector<128x128xi32>
    %16 = arith.addi %5, %15 : vector<128x128xi32>
    %17 = arith.select %14, %16, %5 : vector<128x128xi1>, vector<128x128xi32>
    %18 = arith.truncf %0 : vector<128x128xf32> to vector<128x128xbf16>
    %c0_4 = arith.constant 0 : index
    %c0_5 = arith.constant 0 : index
    %19 = vector.load %arg2[%c0_4, %c0_5] : memref<128x384xbf16, #tpu.memory_space<vmem>>, vector<128x384xbf16>
    %cst = arith.constant dense<0.000000e+00> : vector<128x384xf32>
    %20 = tpu.matmul %18, %19, %cst {dimension_numbers = #tpu.dot_dimension_numbers<[1], [0], [0], [1], [0, 0, 1, 1], [], []>} : vector<128x128xbf16>, vector<128x384xbf16>, vector<128x384xf32> -> vector<128x384xf32>
    %21 = vector.extract_strided_slice %20 {offsets = [0, 0], sizes = [128, 128], strides = [1, 1]} : vector<128x384xf32> to vector<128x128xf32>
    %22 = vector.extract_strided_slice %20 {offsets = [0, 128], sizes = [128, 128], strides = [1, 1]} : vector<128x384xf32> to vector<128x128xf32>
    %23 = vector.extract_strided_slice %20 {offsets = [0, 256], sizes = [128, 128], strides = [1, 1]} : vector<128x384xf32> to vector<128x128xf32>
    %c1_i32_6 = arith.constant 1 : i32
    %24 = vector.broadcast %c1_i32_6 : i32 to vector<128x128xi32>
    %25 = arith.cmpi slt, %17, %24 : vector<128x128xi32>
    %c1_i32_7 = arith.constant 1 : i32
    %26 = tpu.dynamic_rotate %21 by %c1_i32_7 dim 0 : vector<128x128xf32>, i32 -> vector<128x128xf32>
    %cst_8 = arith.constant 0.000000e+00 : f32
    %27 = vector.broadcast %cst_8 : f32 to vector<128x128xf32>
    %28 = arith.select %25, %27, %26 : vector<128x128xi1>, vector<128x128xf32>
    %c15_i32 = arith.constant 15 : i32
    %29 = vector.broadcast %c15_i32 : i32 to vector<128x128xi32>
    %30 = arith.cmpi sge, %17, %29 : vector<128x128xi32>
    %c127_i32 = arith.constant 127 : i32
    %31 = tpu.dynamic_rotate %23 by %c127_i32 dim 0 : vector<128x128xf32>, i32 -> vector<128x128xf32>
    %cst_9 = arith.constant 0.000000e+00 : f32
    %32 = vector.broadcast %cst_9 : f32 to vector<128x128xf32>
    %33 = arith.select %30, %32, %31 : vector<128x128xi1>, vector<128x128xf32>
    %34 = arith.addf %22, %28 : vector<128x128xf32>
    %35 = arith.addf %34, %33 : vector<128x128xf32>
    %c127_i32_10 = arith.constant 127 : i32
    %36 = tpu.dynamic_rotate %0 by %c127_i32_10 dim 0 : vector<128x128xf32>, i32 -> vector<128x128xf32>
    %37 = arith.maximumf %0, %36 : vector<128x128xf32>
    %c120_i32 = arith.constant 120 : i32
    %38 = tpu.dynamic_rotate %37 by %c120_i32 dim 1 : vector<128x128xf32>, i32 -> vector<128x128xf32>
    %39 = arith.maximumf %37, %38 : vector<128x128xf32>
    %40 = arith.truncf %39 : vector<128x128xf32> to vector<128x128xbf16>
    %c0_11 = arith.constant 0 : index
    %c0_12 = arith.constant 0 : index
    %41 = vector.load %arg3[%c0_11, %c0_12] : memref<128x384xbf16, #tpu.memory_space<vmem>>, vector<128x384xbf16>
    %cst_13 = arith.constant dense<0.000000e+00> : vector<128x384xf32>
    %42 = tpu.matmul %40, %41, %cst_13 {dimension_numbers = #tpu.dot_dimension_numbers<[1], [0], [0], [1], [0, 0, 1, 1], [], []>} : vector<128x128xbf16>, vector<128x384xbf16>, vector<128x384xf32> -> vector<128x384xf32>
    %43 = vector.extract_strided_slice %42 {offsets = [0, 0], sizes = [128, 128], strides = [1, 1]} : vector<128x384xf32> to vector<128x128xf32>
    %44 = vector.extract_strided_slice %42 {offsets = [0, 128], sizes = [128, 128], strides = [1, 1]} : vector<128x384xf32> to vector<128x128xf32>
    %45 = vector.extract_strided_slice %42 {offsets = [0, 256], sizes = [128, 128], strides = [1, 1]} : vector<128x384xf32> to vector<128x128xf32>
    %c2_i32 = arith.constant 2 : i32
    %46 = vector.broadcast %c2_i32 : i32 to vector<128x128xi32>
    %47 = arith.cmpi slt, %17, %46 : vector<128x128xi32>
    %c2_i32_14 = arith.constant 2 : i32
    %48 = tpu.dynamic_rotate %43 by %c2_i32_14 dim 0 : vector<128x128xf32>, i32 -> vector<128x128xf32>
    %cst_15 = arith.constant 0.000000e+00 : f32
    %49 = vector.broadcast %cst_15 : f32 to vector<128x128xf32>
    %50 = arith.select %47, %49, %48 : vector<128x128xi1>, vector<128x128xf32>
    %c14_i32 = arith.constant 14 : i32
    %51 = vector.broadcast %c14_i32 : i32 to vector<128x128xi32>
    %52 = arith.cmpi sge, %17, %51 : vector<128x128xi32>
    %c126_i32 = arith.constant 126 : i32
    %53 = tpu.dynamic_rotate %45 by %c126_i32 dim 0 : vector<128x128xf32>, i32 -> vector<128x128xf32>
    %cst_16 = arith.constant 0.000000e+00 : f32
    %54 = vector.broadcast %cst_16 : f32 to vector<128x128xf32>
    %55 = arith.select %52, %54, %53 : vector<128x128xi1>, vector<128x128xf32>
    %56 = arith.addf %44, %50 : vector<128x128xf32>
    %57 = arith.addf %56, %55 : vector<128x128xf32>
    %c1_i32_17 = arith.constant 1 : i32
    %58 = vector.broadcast %c1_i32_17 : i32 to vector<128x128xi32>
    %59 = arith.andi %17, %58 : vector<128x128xi32>
    %c1_i32_18 = arith.constant 1 : i32
    %60 = vector.broadcast %c1_i32_18 : i32 to vector<128x128xi32>
    %61 = arith.cmpi eq, %59, %60 : vector<128x128xi32>
    %c1_i32_19 = arith.constant 1 : i32
    %62 = tpu.dynamic_rotate %57 by %c1_i32_19 dim 0 : vector<128x128xf32>, i32 -> vector<128x128xf32>
    %63 = arith.select %61, %62, %57 : vector<128x128xi1>, vector<128x128xf32>
    %64 = arith.addf %35, %63 : vector<128x128xf32>
    %c0_20 = arith.constant 0 : index
    %c0_21 = arith.constant 0 : index
    %65 = vector.load %arg4[%c0_20, %c0_21] : memref<1x128xf32, #tpu.memory_space<vmem>>, vector<1x128xf32>
    %66 = vector.broadcast %65 : vector<1x128xf32> to vector<128x128xf32>
    %67 = arith.addf %64, %66 : vector<128x128xf32>
    %cst_22 = arith.constant 0.000000e+00 : f32
    %68 = vector.broadcast %cst_22 : f32 to vector<128x128xf32>
    %69 = arith.maximumf %67, %68 : vector<128x128xf32>
    %c0_23 = arith.constant 0 : index
    %c0_24 = arith.constant 0 : index
    %70 = vector.load %arg5[%c0_23, %c0_24] : memref<128x128xf32, #tpu.memory_space<vmem>>, vector<128x128xf32>
    tpu.vector_store %arg5[%c0_23, %c0_24], %69 {strides = array<i32>} : memref<128x128xf32, #tpu.memory_space<vmem>>, vector<128x128xf32>,
    return
  }
  func.func @transform_0(%arg0: i32) -> (i32, i32) {
    %c0_i32 = arith.constant 0 : i32
    %c0_i32_0 = arith.constant 0 : i32
    return %arg0, %c0_i32 : i32, i32
  }
  func.func @transform_1(%arg0: i32) -> (i32, i32) {
    %c0_i32 = arith.constant 0 : i32
    %c0_i32_0 = arith.constant 0 : i32
    %c0_i32_1 = arith.constant 0 : i32
    return %c0_i32, %c0_i32_0 : i32, i32
  }
  func.func @transform_2(%arg0: i32) -> (i32, i32) {
    %c0_i32 = arith.constant 0 : i32
    %c0_i32_0 = arith.constant 0 : i32
    %c0_i32_1 = arith.constant 0 : i32
    return %c0_i32, %c0_i32_0 : i32, i32
  }
  func.func @transform_3(%arg0: i32) -> (i32, i32) {
    %c0_i32 = arith.constant 0 : i32
    %c0_i32_0 = arith.constant 0 : i32
    %c0_i32_1 = arith.constant 0 : i32
    return %c0_i32, %c0_i32_0 : i32, i32
  }
  func.func @transform_4(%arg0: i32) -> (i32, i32) {
    %c0_i32 = arith.constant 0 : i32
    %c0_i32_0 = arith.constant 0 : i32
    return %arg0, %c0_i32 : i32, i32
  }
}

</mosaic_0001>

<bundles_post_ra>
// kernel: _lambda_.1
= control target key start
LH: loop header
LB: loop body
LE: loop exit
PB: predicated region body
PF: predicated region fallthrough
CT: control target
= control target key end

     0   :  { %9 = vsyncpa [#allocation3], 0  ;;  %s3452_s0 = inlined_call_operand.hbm [shape: f32[256,128], index: 0, kind: input, shape index: {}]   ;;  %s3453_s1 = inlined_call_operand.hbm [shape: bf16[128,384], index: 1, kind: input, shape index: {}]   ;;  %s3454_s2 = inlined_call_operand.hbm [shape: bf16[128,384], index: 2, kind: input, shape index: {}]   ;;  %s3455_s3 = inlined_call_operand.vmem [shape: f32[1,128], index: 3, kind: input, shape index: {}]   ;;  %s3456_s4 = inlined_call_operand.hbm [shape: f32[256,128], index: 4, kind: output, shape index: {}]  }
   0x1   :  { %11 = vsyncpa [#allocation3 + $0x1], 0 }
   0x2   :  { %12 = vsyncpa [#allocation6], 0 }
   0x3   :  { %13 = vsyncpa [#allocation4], 0 }
   0x4   :  { %15 = vsyncpa [#allocation4 + $0x1], 0  ;;  %s2445_s15 = smov 0   ;;  %s2447_s16 = smov 0  }
   0x5   :  { %s2449_s17 = smov 0   ;;  %s2451_s18 = smov 0  }
   0x6 LB: > { %s2466_s19 = sadd.s32 4294967295, %s2406_s18   ;;  %s1906_s20 = sadd.s32 4294967294, %s2406_s18   ;;  %s2406_s18 = sphi %s2451_s18, %s3516_s18   ;;  %s2402_s17 = sphi %s2449_s17, %s3515_s17   ;;  %s2398_s16 = sphi %s2447_s16, %s3514_s16   ;;  %s2394_s15 = sphi %s2445_s15, %s3513_s15  }
   0x7   : > { %p41_p0 = scmp.ne.s32.totalorder %s2398_s16, %s2394_s15  ;;  %p3457_p1 = scmp.eq.s32.totalorder %s2466_s19, 0 }
   0x8   : > { %p134_p3 = scmp.eq.s32.totalorder %s1906_s20, 1  ;;  %p1907_p5 = scmp.ge.s32.totalorder %s2406_s18, 1 }
   0x9   : > { %p2475_p4 = por %p3457_p1, %p41_p0  ;;  %p141_p7 = scmp.lt.s32.totalorder %s2406_s18, 3 }
   0xa   : > { %p2480_p6 = por %p134_p3, %p41_p0  ;;  %s2408_s24 = smov [#allocation5]  }
   0xb   : > { %s3463_s21 = scalar_select %p2475_p4, 1, 0 }
   0xc   : > { %s3464_s22 = scalar_select %p2480_p6, 1, 0 }
   0xd   : > { %p2485_p8 = pnand %p1907_p5, %p141_p7  ;;  %s153_s25 = sshll.u32 %s2408_s24, 4  ;;  %s2489_s25 = int_to_ptr.vmem [resolvable:$true] %s153_s25 }
   0xe   : > { %s2409_s27 = smov [#allocation7]   ;;  %s2250_s5 = scalar_lea.hbm %s3453_s1, 3072 }
   0xf   : > { %p2083_p9 = pneg %p2485_p8  ;;  %s166_s28 = sshll.u32 %s2409_s27, 4  ;;  %s2500_s28 = int_to_ptr.vmem [resolvable:$true] %s166_s28 }
  0x10   : > { %p2251_p12 = scmp.ne.s32.totalorder %s3453_s1, %s2250_s5  ;;  %p2257_p5 = scmp.lt.u32.totalorder %s2250_s5, %s3453_s1 }
  0x11   : > { %p2496_p11 = pnand %p2083_p9, %p3457_p1 }
  0x13   : > { %p2252_p13 = pneg %p2496_p11 }
  0x15   : > { %p2253_p0 = pnand %p2252_p13, %p2251_p12 }
  0x17   : > { %p2254_p3 = pneg %p2253_p0 }
  0x19   : > { %p2259_p7 = pnand %p2257_p5, %p2254_p3 }
  0x1b   : > { %2262 = shalt.err (!%p2259_p7)
}
  0x1c   : > { %s2263_s10 = scalar_lea.vmem %s2489_s25, 3072  ;;  %p2271_p2 = scmp.lt.s32.totalorder %s2489_s25, %s2489_s25 }
  0x1d   : > { %p2264_p9 = scmp.ne.s32.totalorder %s2489_s25, %s2263_s10  ;;  %p2272_p12 = scmp.lt.s32.totalorder %s2263_s10, %s2263_s10 }
  0x1f   : > { %p2266_p10 = pnand %p2264_p9, %p2252_p13  ;;  %p2273_p0 = por %p2272_p12, %p2271_p2 }
  0x21   : > { %p2267_p1 = pneg %p2266_p10 }
  0x23   : > { %p2274_p6 = pnand %p2273_p0, %p2267_p1 }
  0x25   : > { %2277 = shalt.err (!%p2274_p6)
}
  0x26   : > { %s2410_s11 = smov 192   ;;  %s2411_s12 = smov 12  }
  0x27   : > { %2086 = dma.hbm_to_vmem [thread:$0]  (!%p2496_p11), %s3453_s1, 3072, %s2489_s25, [#allocation6], %s2410_s11, %s2410_s11, %s2411_s12  }
  0x28   : > { %s2278_s27 = scalar_lea.hbm %s3454_s2, 3072 }
  0x29   : > { %p2279_p2 = scmp.ne.s32.totalorder %s3454_s2, %s2278_s27  ;;  %p2285_p10 = scmp.lt.u32.totalorder %s2278_s27, %s3454_s2 }
  0x2b   : > { %p2281_p1 = pnand %p2279_p2, %p2252_p13 }
  0x2d   : > { %p2282_p6 = pneg %p2281_p1 }
  0x2f   : > { %p2287_p3 = pnand %p2285_p10, %p2282_p6 }
  0x31   : > { %2290 = shalt.err (!%p2287_p3)
}
  0x32   : > { %s2291_s25 = scalar_lea.vmem %s2500_s28, 3072  ;;  %p2299_p12 = scmp.lt.s32.totalorder %s2500_s28, %s2500_s28 }
  0x33   : > { %p2292_p5 = scmp.ne.s32.totalorder %s2500_s28, %s2291_s25  ;;  %p2300_p0 = scmp.lt.s32.totalorder %s2291_s25, %s2291_s25 }
  0x35   : > { %p2294_p7 = pnand %p2292_p5, %p2252_p13  ;;  %p2301_p2 = por %p2300_p0, %p2299_p12 }
  0x37   : > { %p2295_p9 = pneg %p2294_p7 }
  0x39   : > { %p2302_p1 = pnand %p2301_p2, %p2295_p9 }
  0x3b   : > { %2305 = shalt.err (!%p2302_p1)
}
  0x3c   : > { %2089 = dma.hbm_to_vmem [thread:$0]  (!%p2496_p11), %s3454_s2, 3072, %s2500_s28, [#allocation6], %s2410_s11, %s2410_s11, %s2411_s12  }
  0x3d   : > { %s2555_s9 = sadd.s32 1, %s2406_s18   ;;  %s28_s26 = sadd.s32 1, %s2402_s17 }
  0x3e   : > { %s25_s10 = ssub.s32 %s2406_s18, %s2555_s9  ;;  %p35_p13 = scmp.ne.s32.totalorder %s2402_s17, %s2398_s16 }
  0x3f   : > { %p26_p6 = scmp.eq.s32.totalorder %s25_s10, 0  ;;  %p36_p10 = scmp.eq.s32.totalorder %s2406_s18, 0 }
  0x40   : > { %p3467_p3 = scmp.eq.s32.totalorder %s2466_s19, 1  ;;  %p2100_p7 = scmp.lt.s32.totalorder %s2406_s18, 2 }
  0x41   : > { %s2571_s14 = scalar_select %p26_p6, %s2402_s17, %s28_s26  }
  0x42   : > { %p2565_p5 = por %p3467_p3, %p35_p13  ;;  %p37_p9 = por %p36_p10, %p35_p13 }
  0x43   : > { %s183_s20 = sand.u32 1, %s2402_s17   ;;  %s1973_s28 = sshll.u32 %s2406_s18, 11 }
  0x44   : > { %s3468_s13 = scalar_select %p2565_p5, 1, 0 }
  0x45   : > { %s1911_s24 = sshll.u32 %s183_s20, 7  ;;  %s2578_s27 = scalar_lea.hbm %s3452_s0, %s1973_s28 }
  0x46   : > { %s187_s29 = scalar_lea.vmem [#allocation2], %s1911_s24  ;;  %p2582_p11 = pnand %p2100_p7, %p37_p9 }
  0x47   : > { %s194_s30 = sshll.u32 %s187_s29, 4  ;;  %s2586_s6 = scalar_lea.sflag [#allocation3], %s183_s20  ;;  %s2580_s30 = int_to_ptr.vmem [resolvable:$true] %s194_s30 }
  0x48   : > { %s2306_s25 = scalar_lea.hbm %s2578_s27, 2048  ;;  %p2308_p0 = pneg %p2582_p11 }
  0x49   : > { %p2307_p12 = scmp.ne.s32.totalorder %s2578_s27, %s2306_s25  ;;  %s2311_s26 = scalar_lea.hbm %s3452_s0, 4096 }
  0x4a   : > { %p2312_p13 = scmp.lt.u32.totalorder %s2578_s27, %s3452_s0  ;;  %p2313_p6 = scmp.lt.u32.totalorder %s2311_s26, %s2306_s25 }
  0x4b   : > { %p2309_p2 = pnand %p2308_p0, %p2307_p12  ;;  %p2315_p3 = scmp.lt.u32.totalorder %s2306_s25, %s2578_s27 }
  0x4c   : > { %p2314_p10 = por %p2313_p6, %p2312_p13 }
  0x4d   : > { %p2310_p1 = pneg %p2309_p2 }
  0x4e   : > { %p2316_p7 = por %p2315_p3, %p2314_p10 }
  0x50   : > { %p2317_p9 = pnand %p2316_p7, %p2310_p1 }
  0x52   : > { %2320 = shalt.err (!%p2317_p9)
}
  0x53   : > { %s2321_s20 = scalar_lea.vmem %s2580_s30, 2048  ;;  %s2412_s28 = smov [#allocation2]  }
  0x54   : > { %p2322_p12 = scmp.ne.s32.totalorder %s2580_s30, %s2321_s20  ;;  %s2326_s11 = sshll.u32 %s2412_s28, 4  ;;  %s2327_s11 = int_to_ptr.vmem [resolvable:$false] %s2326_s11 }
  0x55   : > { %s2328_s12 = scalar_lea.vmem %s2327_s11, 4096  ;;  %p2329_p4 = scmp.lt.s32.totalorder %s2580_s30, %s2327_s11 }
  0x56   : > { %p2324_p2 = pnand %p2322_p12, %p2308_p0  ;;  %p2330_p13 = scmp.lt.s32.totalorder %s2328_s12, %s2321_s20 }
  0x58   : > { %p2325_p5 = pneg %p2324_p2  ;;  %p2331_p6 = por %p2330_p13, %p2329_p4 }
  0x5a   : > { %p2332_p10 = pnand %p2331_p6, %p2325_p5 }
  0x5c   : > { %2335 = shalt.err (!%p2332_p10)
}
  0x5d   : > { %s2413_s29 = smov 128   ;;  %s2414_s25 = smov 8  }
  0x5e   : > { %2093 = dma.hbm_to_vmem [thread:$0]  (!%p2582_p11), %s2578_s27, 2048, %s2580_s30, %s2586_s6, %s2413_s29, %s2413_s29, %s2414_s25  }
  0x5f   : > { %206 = sbr.rel (%p2485_p8) target bundleno = 544 (0x220), region = 36 }
  0x66   : > { %s2617_s7 = sand.u32 1, %s2398_s16   ;;  %p3470_p4 = scmp.ne.s32.totalorder %s3463_s21, 0 }
  0x67   : > { %s1915_s8 = sshll.u32 %s2617_s7, 7  ;;  %s209_s26 = scalar_lea.sflag [#allocation3], %s2617_s7 }
  0x68   : > { %s2623_s10 = scalar_lea.vmem [#allocation2], %s1915_s8 }
  0x69   : > { %2381 = dma.done.wait (%p3470_p4), %s209_s26, 2048  }
  0x6a   : > { %2383 = vsyncadd (%p3470_p4), %s209_s26, 4294965248  ;;  %p3471_p5 = scmp.eq.s32.totalorder %s2466_s19, 0 }
  0x6c   : > { %2385 = dma.done.wait (%p3471_p5), [#allocation6], 6144   ;;  %p3472_p8 = pmov %p3471_p5 }
  0x6d   : > { %v264_v0 = vlaneseq  ;;  %v2415_v1 = vmov 0   ;;  %v2186_v3 = vld [vmem:[#allocation5 + $0x4] ss:$12 sps:$4 sm:$0xff]   ;;  %v2188_v4 = vld [vmem:[#allocation5] ss:$12 sps:$4 sm:$0xff]   ;;  %v2650_v15 = vld [vmem:[%s2623_s10 + $0x18] sm:$0xff] }
  0x6e   : > { %2387 = vsyncadd (%p3472_p8), [#allocation6], 4294961152  ;;  %673 = vmatprep.mubr.bf16.mxu0 %v2415_v1  ;;  %641 = vmatprep.subr.bf16.mxu0 %v2186_v3  ;;  %v2189_v5 = vld [vmem:[#allocation5 + $0x1c] ss:$12 sps:$4 sm:$0xff]   ;;  %v2637_v6 = vld [vmem:[%s2623_s10] sm:$0xff]  ;;  %v1016_v18 = vrot.slane %v2650_v15, 1 }
  0x6f   : > { %v2634_v2 = vshrl.u32 %v264_v0, 7  ;;  %v249_v7 = vld [vmem:[%s2623_s10 + $0x8] sm:$0xff]  ;;  %642 = vmatpush1.bf16.msra.mxu0 %v2188_v4  ;;  %v2642_v8 = vld [vmem:[%s2623_s10 + $0x10] sm:$0xff]  ;;  %v1013_v9 = vrot.slane %v2637_v6, 1  ;;  %v2191_v11 = vld [vmem:[#allocation5 + $0x18] ss:$12 sps:$4 sm:$0xff]  }
  0x70   : > { %v1014_v10 = vrot.slane %v249_v7, 1  ;;  %v2646_v12 = vpack.c.bf16 %v249_v7, %v2637_v6  ;;  %643 = vmatprep.subr.bf16.mxu0 %v2189_v5  ;;  %v1015_v13 = vrot.slane %v2642_v8, 1  ;;  %v2192_v14 = vld [vmem:[#allocation5 + $0x34] ss:$12 sps:$4 sm:$0xff]   ;;  %v2668_v22 = vld [vmem:[%s2623_s10 + $0x28] sm:$0xff]  ;;  %v2685_v32 = vld [vmem:[%s2623_s10 + $0x38] sm:$0xff] }
  0x71   : > { %vm948_vm0 = vcmp.lt.s32.totalorder %v2634_v2, 7  ;;  %v2657_v17 = vld [vmem:[%s2623_s10 + $0x20] sm:$0xff]  ;;  %v2194_v25 = vld [vmem:[#allocation5 + $0x30] ss:$12 sps:$4 sm:$0xff]   ;;  %v1018_v27 = vrot.slane %v2668_v22, 1  ;;  %v1020_v37 = vrot.slane %v2685_v32, 1 }
  0x72   : > { %v1043_v16 = vsel %vm948_vm0, %v1013_v9, %v1014_v10  ;;  %2023 = vmatprep.mubr.bf16.mxu1 %v2646_v12  ;;  %v1042_v19 = vsel %vm948_vm0, %v1014_v10, %v1015_v13  ;;  %v1017_v21 = vrot.slane %v2657_v17, 1  ;;  %v1041_v24 = vsel %vm948_vm0, %v1015_v13, %v1016_v18  ;;  %v2675_v26 = vld [vmem:[%s2623_s10 + $0x30] sm:$0xff]  ;;  %v2195_v30 = vld [vmem:[#allocation5 + $0x4c] ss:$12 sps:$4 sm:$0xff]   ;;  %v2695_v36 = vld [vmem:[%s2623_s10 + $0x40] sm:$0xff]  ;;  %s2416_s21 = smov 120  }
  0x73   : > { %v2664_v20 = vmax.f32 %v2637_v6, %v1043_v16  ;;  %v2670_v23 = vmax.f32 %v249_v7, %v1042_v19  ;;  %644 = vmatpush1.bf16.msra.mxu0 %v2191_v11  ;;  %v2681_v29 = vmax.f32 %v2642_v8, %v1041_v24  ;;  %v1019_v31 = vrot.slane %v2675_v26, 1  ;;  %v2713_v44 = vld [vmem:[%s2623_s10 + $0x48] sm:$0xff]  ;;  %v2716_v45 = vld [vmem:[%s2623_s10 + $0x50] sm:$0xff]  ;;  %v2726_v51 = vld [vmem:[%s2623_s10 + $0x58] sm:$0xff]  ;;  %s3169_s30 = scalar_lea.vmem [#allocation8], %s1915_s8  ;;  %s1974_s5 = sshll.u32 %s2466_s19, 11 }
  0x74   : > { %645 = vmatprep.subr.bf16.mxu0 %v2192_v14  ;;  %v1040_v28 = vsel %vm948_vm0, %v1016_v18, %v1017_v21  ;;  %v1039_v35 = vsel %vm948_vm0, %v1017_v21, %v1018_v27  ;;  %v1021_v40 = vrot.slane %v2695_v36, 1  ;;  %v2197_v46 = vld [vmem:[#allocation5 + $0x48] ss:$12 sps:$4 sm:$0xff]   ;;  %v1022_v49 = vrot.slane %v2713_v44, 1  ;;  %v2198_v53 = vld [vmem:[#allocation5 + $0x64] ss:$12 sps:$4 sm:$0xff]   ;;  %s3402_s28 = scalar_lea.hbm %s3456_s4, %s1974_s5 }
  0x75   : > { %v2146_v33 = vpack.i.bf16 %v2670_v23, %v2664_v20  ;;  %v2690_v34 = vmax.f32 %v2650_v15, %v1040_v28  ;;  %v1038_v38 = vsel %vm948_vm0, %v1018_v27, %v1019_v31  ;;  %v2701_v39 = vmax.f32 %v2657_v17, %v1039_v35  ;;  %v2734_v55 = vld [vmem:[%s2623_s10 + $0x60] sm:$0xff]  ;;  %v2201_v62 = vld [vmem:[#allocation5 + $0x7c] ss:$12 sps:$4 sm:$0xff]   ;;  %v2756_v4 = vld [vmem:[%s2623_s10 + $0x70] sm:$0xff]  ;;  %s1814_s6 = sshll.u32 %s3169_s30, 4  ;;  %s1801_s19 = scalar_lea.sflag [#allocation4], %s2617_s7  ;;  %s3404_s6 = int_to_ptr.vmem [resolvable:$true] %s1814_s6 }
  0x76   : > { %v2708_v42 = vmax.f32 %v2668_v22, %v1038_v38  ;;  %v1037_v43 = vsel %vm948_vm0, %v1019_v31, %v1020_v37  ;;  %v1036_v47 = vsel %vm948_vm0, %v1020_v37, %v1021_v40  ;;  %v1023_v50 = vrot.slane %v2716_v45, 1  ;;  %v2200_v57 = vld [vmem:[#allocation5 + $0x60] ss:$12 sps:$4 sm:$0xff]   ;;  %v2765_v13 = vld [vmem:[%s2623_s10 + $0x78] sm:$0xff]  ;;  %v2210_v21 = vld [vmem:[#allocation5 + $0x8] ss:$12 sps:$4 sm:$0xff]  }
  0x77   : > { %2147 = vrot.lane.b32.xlu0 %v2146_v33, %s2416_s21  ;;  %v2151_v41 = vpack.i.bf16 %v2690_v34, %v2681_v29  ;;  %646 = vmatpush1.bf16.msra.mxu0 %v2194_v25  ;;  %v2721_v48 = vmax.f32 %v2675_v26, %v1037_v43  ;;  %v2731_v54 = vmax.f32 %v2685_v32, %v1036_v47  ;;  %v1024_v56 = vrot.slane %v2726_v51, 1  ;;  %v2753_v3 = vld [vmem:[%s2623_s10 + $0x68] sm:$0xff]  ;;  %v2203_v33 = vld [vmem:[#allocation5 + $0x78] ss:$12 sps:$4 sm:$0xff]   ;;  %v2204_v38 = vld [vmem:[#allocation5 + $0x94] ss:$12 sps:$4 sm:$0xff]  }
  0x78   : > { %647 = vmatprep.subr.bf16.mxu0 %v2195_v30  ;;  %v2156_v52 = vpack.i.bf16 %v2708_v42, %v2701_v39  ;;  %v1034_v58 = vsel %vm948_vm0, %v1022_v49, %v1023_v50  ;;  %v1035_v59 = vsel %vm948_vm0, %v1021_v40, %v1022_v49  ;;  %v1025_v60 = vrot.slane %v2734_v55, 1  ;;  %v2211_v27 = vld [vmem:[#allocation5 + $0x20] ss:$12 sps:$4 sm:$0xff]   ;;  %2007 = vmatprep.subr.bf16.mxu1 %v2210_v21  ;;  %v2213_v49 = vld [vmem:[#allocation5 + $0x50] ss:$12 sps:$4 sm:$0xff]   ;;  %s2336_s11 = scalar_lea.vmem %s3404_s6, 2048 }
  0x79   : > { %v2161_v61 = vpack.i.bf16 %v2731_v54, %v2721_v48  ;;  %v2747_v63 = vmax.f32 %v2695_v36, %v1035_v59  ;;  %v2750_v0 = vmax.f32 %v2713_v44, %v1034_v58  ;;  %v1033_v7 = vsel %vm948_vm0, %v1023_v50, %v1024_v56  ;;  %2008 = vmatpush3.bf16.msra.mxu1 %v2210_v21  ;;  %v2207_v47 = vld [vmem:[#allocation5 + $0xac] ss:$12 sps:$4 sm:$0xff]   ;;  %v2209_v50 = vld [vmem:[#allocation5 + $0xa8] ss:$12 sps:$4 sm:$0xff]   ;;  %p2337_p11 = scmp.ne.s32.totalorder %s3404_s6, %s2336_s11  ;;  %p3510_p0 = scmp.ne.s32.totalorder %s3468_s13, 0 }
  0x7a   : > { %2157 = vrot.lane.b32.xlu1 %v2156_v52, %s2416_s21  ;;  %v1032_v5 = vsel %vm948_vm0, %v1024_v56, %v1025_v60  ;;  %v1026_v10 = vrot.slane %v2753_v3, 1  ;;  %v1027_v11 = vrot.slane %v2756_v4, 1  ;;  %v2770_v16 = vmax.f32 %v2716_v45, %v1033_v7  ;;  %2009 = vmatprep.subr.bf16.mxu1 %v2211_v27  ;;  %v2221_v52 = vld [vmem:[#allocation7 + $0x8] ss:$12 sps:$4 sm:$0xff]   ;;  %v2228_v56 = vld [vmem:[#allocation7 + $0x20] ss:$12 sps:$4 sm:$0xff]  }
  0x7b   : > { %2152 = vrot.lane.b32.xlu0 %v2151_v41, %s2416_s21  ;;  %648 = vmatpush1.bf16.msra.mxu0 %v2197_v46  ;;  %v2166_v14 = vpack.i.bf16 %v2750_v0, %v2747_v63  ;;  %v2773_v18 = vmax.f32 %v2726_v51, %v1032_v5  ;;  %v1028_v19 = vrot.slane %v2765_v13, 1  ;;  %v2212_v46 = vld [vmem:[#allocation5 + $0x38] ss:$12 sps:$4 sm:$0xff]   ;;  %v475_v7 = vpack.c.bf16 %v2668_v22, %v2657_v17  ;;  %p2338_p1 = pnand %p2337_p11, %p3510_p0  ;;  %s2417_s12 = smov [#allocation8]  }
  0x7c   : > { %649 = vmatprep.subr.bf16.mxu0 %v2198_v53  ;;  %v1030_v24 = vsel %vm948_vm0, %v1026_v10, %v1027_v11  ;;  %v1031_v25 = vsel %vm948_vm0, %v1025_v60, %v1026_v10  ;;  %v2214_v53 = vld [vmem:[#allocation5 + $0x68] ss:$12 sps:$4 sm:$0xff]   ;;  %v2232_v58 = vld [vmem:[#allocation7 + $0x38] ss:$12 sps:$4 sm:$0xff]   ;;  %v474_v60 = vpack.c.bf16 %v2650_v15, %v2642_v8  ;;  %v2218_v8 = vld [vmem:[#allocation7] ss:$12 sps:$4 sm:$0xff]   ;;  %v476_v17 = vpack.c.bf16 %v2685_v32, %v2675_v26 }
  0x7d   : > { %v2171_v28 = vpack.i.bf16 %v2773_v18, %v2770_v16  ;;  %v2785_v30 = vmax.f32 %v2734_v55, %v1031_v25  ;;  %v2788_v31 = vmax.f32 %v2753_v3, %v1030_v24  ;;  %v1029_v35 = vsel %vm948_vm0, %v1027_v11, %v1028_v19  ;;  %2010 = vmatpush3.bf16.msra.mxu1 %v2211_v27  ;;  %v2216_v59 = vld [vmem:[#allocation5 + $0x98] ss:$12 sps:$4 sm:$0xff]   ;;  %v2224_v15 = vld [vmem:[#allocation7 + $0x1c] ss:$12 sps:$4 sm:$0xff]   ;;  %v2244_v10 = vld [vmem:[#allocation7 + $0x80] ss:$12 sps:$4 sm:$0xff]   ;;  %p2339_p3 = pneg %p2338_p1 }
  0x7e   : > { %2162 = vrot.lane.b32.xlu1 %v2161_v61, %s2416_s21  ;;  %v1044_v37 = vsel %vm948_vm0, %v1028_v19, %v1013_v9  ;;  %v2799_v41 = vmax.f32 %v2756_v4, %v1029_v35  ;;  %v2206_v9 = vld [vmem:[#allocation5 + $0x90] ss:$12 sps:$4 sm:$0xff]   ;;  %2011 = vmatprep.subr.bf16.mxu1 %v2212_v46  ;;  %v2222_v11 = vld [vmem:[#allocation7 + $0x18] ss:$12 sps:$4 sm:$0xff]   ;;  %v477_v24 = vpack.c.bf16 %v2713_v44, %v2695_v36  ;;  %v2229_v27 = vld [vmem:[#allocation7 + $0x48] ss:$12 sps:$4 sm:$0xff]  }
  0x7f   : > { %2167 = vrot.lane.b32.xlu0 %v2166_v14, %s2416_s21  ;;  %650 = vmatpush1.bf16.msra.mxu0 %v2200_v57  ;;  %v2176_v40 = vpack.i.bf16 %v2788_v31, %v2785_v30  ;;  %v2802_v43 = vmax.f32 %v2765_v13, %v1044_v37  ;;  %v2215_v57 = vld [vmem:[#allocation5 + $0x80] ss:$12 sps:$4 sm:$0xff]   ;;  %v2236_v61 = vld [vmem:[#allocation7 + $0x50] ss:$12 sps:$4 sm:$0xff]   ;;  %v2248_v22 = vld [vmem:[#allocation7 + $0x98] ss:$12 sps:$4 sm:$0xff]   ;;  %v479_v36 = vpack.c.bf16 %v2753_v3, %v2734_v55 }
  0x80   : > { %651 = vmatprep.subr.bf16.mxu0 %v2201_v62  ;;  %v2217_v62 = vld [vmem:[#allocation5 + $0xb0] ss:$12 sps:$4 sm:$0xff]   ;;  %v2227_v14 = vld [vmem:[#allocation7 + $0x34] ss:$12 sps:$4 sm:$0xff]   ;;  %v2231_v21 = vld [vmem:[#allocation7 + $0x4c] ss:$12 sps:$4 sm:$0xff]  }
  0x81   : > { %v2181_v6 = vpack.i.bf16 %v2802_v43, %v2799_v41  ;;  %2012 = vmatpush3.bf16.msra.mxu1 %v2212_v46  ;;  %v2220_v5 = vld [vmem:[#allocation7 + $0x4] ss:$12 sps:$4 sm:$0xff]   ;;  %v2233_v32 = vld [vmem:[#allocation7 + $0x60] ss:$12 sps:$4 sm:$0xff]   ;;  %v2245_v55 = vld [vmem:[#allocation7 + $0xa8] ss:$12 sps:$4 sm:$0xff]  }
  0x82   : > { %2172 = vrot.lane.b32.xlu1 %v2171_v28, %s2416_s21  ;;  %2013 = vmatprep.subr.bf16.mxu1 %v2213_v49  ;;  %v2225_v19 = vld [vmem:[#allocation7 + $0x30] ss:$12 sps:$4 sm:$0xff]   ;;  %v478_v28 = vpack.c.bf16 %v2726_v51, %v2716_v45  ;;  %v2237_v44 = vld [vmem:[#allocation7 + $0x78] ss:$12 sps:$4 sm:$0xff]   ;;  %v2243_v35 = vld [vmem:[#allocation7 + $0x94] ss:$12 sps:$4 sm:$0xff]   ;;  %v480_v45 = vpack.c.bf16 %v2765_v13, %v2756_v4 }
  0x83   : > { %2177 = vrot.lane.b32.xlu0 %v2176_v40, %s2416_s21  ;;  %652 = vmatpush1.bf16.msra.mxu0 %v2203_v33  ;;  %v2249_v25 = vld [vmem:[#allocation7 + $0xb0] ss:$12 sps:$4 sm:$0xff]   ;;  %v2247_v51 = vld [vmem:[#allocation7 + $0xac] ss:$12 sps:$4 sm:$0xff]   ;;  %vm883_vm1 = vcmp.lt.s32.totalorder %v2634_v2, 1  ;;  %s2340_s29 = sshll.u32 %s2417_s12, 4  ;;  %s2341_s29 = int_to_ptr.vmem [resolvable:$false] %s2340_s29 }
  0x84   : > { %653 = vmatprep.subr.bf16.mxu0 %v2204_v38  ;;  %v2235_v26 = vld [vmem:[#allocation7 + $0x64] ss:$12 sps:$4 sm:$0xff]   ;;  %v2239_v33 = vld [vmem:[#allocation7 + $0x7c] ss:$12 sps:$4 sm:$0xff]   ;;  %s2342_s25 = scalar_lea.vmem %s2341_s29, 4096  ;;  %p2343_p7 = scmp.lt.s32.totalorder %s3404_s6, %s2341_s29 }
  0x85   : > { %2014 = vmatpush3.bf16.msra.mxu1 %v2213_v49  ;;  %v2241_v37 = vld [vmem:[#allocation7 + $0x90] ss:$12 sps:$4 sm:$0xff]   ;;  %p2344_p9 = scmp.lt.s32.totalorder %s2342_s25, %s2336_s11 }
  0x86   : > { %2182 = vrot.lane.b32.xlu1 %v2181_v6, %s2416_s21  ;;  %2015 = vmatprep.subr.bf16.mxu1 %v2214_v53 }
  0x87   : > { %654 = vmatpush1.bf16.msra.mxu0 %v2206_v9  ;;  %p2345_p12 = por %p2344_p9, %p2343_p7 }
  0x88   : > { %655 = vmatprep.subr.bf16.mxu0 %v2207_v47 }
  0x89   : > { %2016 = vmatpush3.bf16.msra.mxu1 %v2214_v53  ;;  %p2346_p2 = pnand %p2345_p12, %p2339_p3 }
  0x8a   : > { %2017 = vmatprep.subr.bf16.mxu1 %v2215_v57 }
  0x8b   : > { %656 = vmatpush1.bf16.msra.mxu0 %v2209_v50 }
  0x8c   : > { %2039 = vmatprep.subr.bf16.mxu0 %v2221_v52 }
  0x8d   : > { %2018 = vmatpush3.bf16.msra.mxu1 %v2215_v57 }
  0x8e   : > { %674 = vmatmul.mubr.bf16.vlgmr.msra.gmra.mrb[0].mxu0 %v2646_v12  ;;  %2019 = vmatprep.subr.bf16.mxu1 %v2216_v59  ;;  %v2240_v12 = vld [vmem:[#allocation7 + $0x68] ss:$12 sps:$4 sm:$0xff]  }
  0x8f   : > { %683 = vmatprep.mubr.bf16.mxu0 %v2415_v1  ;;  %2040 = vmatpush3.bf16.msra.mxu0 %v2221_v52 }
  0x90   : > { %2041 = vmatprep.subr.bf16.mxu0 %v2228_v56 }
  0x91   : > { %2020 = vmatpush3.bf16.msra.mxu1 %v2216_v59 }
  0x92   : > { %2021 = vmatprep.subr.bf16.mxu1 %v2217_v62 }
  0x93   : > { %2042 = vmatpush3.bf16.msra.mxu0 %v2228_v56 }
  0x94   : > { %2043 = vmatprep.subr.bf16.mxu0 %v2232_v58 }
  0x95   : > { %2022 = vmatpush3.bf16.msra.mxu1 %v2217_v62 }
  0x96   : > { %684 = vmatmul.mubr.bf16.gmra.mrb[4].mxu0 %v474_v60  ;;  %1277 = vmatprep.subr.bf16.mxu1 %v2220_v5 }
  0x97   : > { %693 = vmatprep.mubr.bf16.mxu0 %v2415_v1  ;;  %2044 = vmatpush3.bf16.msra.mxu0 %v2232_v58 }
  0x98   : > { %2045 = vmatprep.subr.bf16.mxu0 %v2236_v61  ;;  %2024 = vmatmul.mubr.bf16.vlgmr.msra.gmra.mrb[0].mxu1 %v474_v60 }
  0x99   : > { %2027 = vmatprep.mubr.bf16.mxu1 %v475_v7  ;;  %1278 = vmatpush1.bf16.msra.mxu1 %v2218_v8 }
  0x9a   : > { %1279 = vmatprep.subr.bf16.mxu1 %v2224_v15 }
  0x9b   : > { %2046 = vmatpush3.bf16.msra.mxu0 %v2236_v61 }
  0x9c   : > { %2047 = vmatprep.subr.bf16.mxu0 %v2240_v12 }
  0x9d   : > { %1280 = vmatpush1.bf16.msra.mxu1 %v2222_v11 }
  0x9e   : > { %694 = vmatmul.mubr.bf16.gmra.mrb[8].mxu0 %v475_v7  ;;  %1281 = vmatprep.subr.bf16.mxu1 %v2227_v14 }
  0x9f   : > { %703 = vmatprep.mubr.bf16.mxu0 %v2415_v1  ;;  %2048 = vmatpush3.bf16.msra.mxu0 %v2240_v12 }
  0xa0   : > { %2049 = vmatprep.subr.bf16.mxu0 %v2244_v10  ;;  %2028 = vmatmul.mubr.bf16.gmra.mrb[4].mxu1 %v476_v17 }
  0xa1   : > { %2031 = vmatprep.mubr.bf16.mxu1 %v477_v24  ;;  %1282 = vmatpush1.bf16.msra.mxu1 %v2225_v19 }
  0xa2   : > { %1283 = vmatprep.subr.bf16.mxu1 %v2231_v21 }
  0xa3   : > { %2050 = vmatpush3.bf16.msra.mxu0 %v2244_v10 }
  0xa4   : > { %2051 = vmatprep.subr.bf16.mxu0 %v2248_v22 }
  0xa5   : > { %1284 = vmatpush1.bf16.msra.mxu1 %v2229_v27 }
  0xa6   : > { %704 = vmatmul.mubr.bf16.gmra.mrb[12].mxu0 %v476_v17  ;;  %1285 = vmatprep.subr.bf16.mxu1 %v2235_v26 }
  0xa7   : > { %713 = vmatprep.mubr.bf16.mxu0 %v2415_v1  ;;  %2052 = vmatpush3.bf16.msra.mxu0 %v2248_v22 }
  0xa8   : > { %2053 = vmatprep.subr.bf16.mxu0 %v2249_v25  ;;  %2032 = vmatmul.mubr.bf16.gmra.mrb[8].mxu1 %v478_v28 }
  0xa9   : > { %2035 = vmatprep.mubr.bf16.mxu1 %v479_v36  ;;  %1286 = vmatpush1.bf16.msra.mxu1 %v2233_v32 }
  0xaa   : > { %1287 = vmatprep.subr.bf16.mxu1 %v2239_v33 }
  0xab   : > { %2054 = vmatpush3.bf16.msra.mxu0 %v2249_v25 }
  0xad   : > { %1288 = vmatpush1.bf16.msra.mxu1 %v2237_v44 }
  0xae   : > { %714 = vmatmul.mubr.bf16.gmra.mrb[16].mxu0 %v477_v24  ;;  %1289 = vmatprep.subr.bf16.mxu1 %v2243_v35 }
  0xaf   : > { %723 = vmatprep.mubr.bf16.mxu0 %v2415_v1 }
  0xb0   : > { %2036 = vmatmul.mubr.bf16.gmra.mrb[12].mxu1 %v480_v45 }
  0xb1   : > { %1290 = vmatpush1.bf16.msra.mxu1 %v2241_v37  ;;  %1309 = vmatprep.mubr.bf16.mxu1 %v2415_v1 }
  0xb2   : > { %1291 = vmatprep.subr.bf16.mxu1 %v2247_v51  ;;  %v269_v51 = vadd.s32 32, %v2634_v2 }
  0xb5   : > { %1292 = vmatpush1.bf16.msra.mxu1 %v2245_v55 }
  0xb6   : > { %724 = vmatmul.mubr.bf16.gmra.mrb[20].mxu0 %v478_v28 }
  0xb7   : > { %733 = vmatprep.mubr.bf16.mxu0 %v2415_v1 }
  0xbe   : > { %734 = vmatmul.mubr.bf16.gmra.mrb[24].mxu0 %v479_v36 }
  0xbf   : > { %743 = vmatprep.mubr.bf16.mxu0 %v2415_v1 }
  0xc6   : > { %744 = vmatmul.mubr.bf16.gmra.mrb[28].mxu0 %v480_v45 }
  0xe9   : > { %v2148_v3 = vpop.permute.xlu0 %2147 }
  0xea   : > { %v2150_v38 = vunpack.i.h.bf16 %v2148_v3  ;;  %v2149_v40 = vunpack.i.l.bf16 %v2148_v3 }
  0xec   : > { %v1094_v4 = vmax.f32 %v2670_v23, %v2150_v38  ;;  %v1093_v13 = vmax.f32 %v2664_v20, %v2149_v40  ;;  %v2158_v6 = vpop.permute.xlu1 %2157 }
  0xed   : > { %v2153_v46 = vpop.permute.xlu0 %2152  ;;  %v2160_v50 = vunpack.i.h.bf16 %v2158_v6  ;;  %v2159_v52 = vunpack.i.l.bf16 %v2158_v6  ;;  %v2874_v6 = vand.u32 15, %v269_v51 }
  0xee   : > { %v1109_v9 = vpack.c.bf16 %v1094_v4, %v1093_v13  ;;  %v2155_v47 = vunpack.i.h.bf16 %v2153_v46  ;;  %v2154_v49 = vunpack.i.l.bf16 %v2153_v46 }
  0xef   : > { %v1098_v57 = vmax.f32 %v2708_v42, %v2160_v50  ;;  %v1097_v58 = vmax.f32 %v2701_v39, %v2159_v52  ;;  %v271_v50 = vadd.s32 48, %v2634_v2  ;;  %vm855_vm3 = vcmp.lt.s32.totalorder %v2874_v6, 1 }
  0xf0   : > { %v1096_v53 = vmax.f32 %v2690_v34, %v2155_v47  ;;  %v1095_v56 = vmax.f32 %v2681_v29, %v2154_v49  ;;  %1310 = vmatmul.mubr.bf16.vlgmr.msra.gmra.mrb[16].mxu1 %v1109_v9  ;;  %2055 = vmatprep.mubr.bf16.mxu0 %v1109_v9  ;;  %v2163_v23 = vpop.permute.xlu1 %2162  ;;  %v266_v9 = vadd.s32 8, %v2634_v2 }
  0xf1   : > { %1319 = vmatprep.mubr.bf16.mxu1 %v2415_v1  ;;  %v2168_v20 = vpop.permute.xlu0 %2167  ;;  %v2165_v60 = vunpack.i.h.bf16 %v2163_v23  ;;  %v2164_v61 = vunpack.i.l.bf16 %v2163_v23  ;;  %v1111_v12 = vpack.c.bf16 %v1098_v57, %v1097_v58 }
  0xf2   : > { %v1110_v59 = vpack.c.bf16 %v1096_v53, %v1095_v56  ;;  %v2170_v62 = vunpack.i.h.bf16 %v2168_v20  ;;  %v2169_v5 = vunpack.i.l.bf16 %v2168_v20  ;;  %v2881_v57 = vand.u32 15, %v266_v9 }
  0xf3   : > { %v1100_v34 = vmax.f32 %v2731_v54, %v2165_v60  ;;  %v1099_v29 = vmax.f32 %v2721_v48, %v2164_v61 }
  0xf4   : > { %2056 = vmatmul.mubr.bf16.vlgmr.msra.gmra.mrb[32].mxu0 %v1110_v59  ;;  %v1102_v42 = vmax.f32 %v2750_v0, %v2170_v62  ;;  %v1101_v39 = vmax.f32 %v2747_v63, %v2169_v5  ;;  %v2173_v7 = vpop.permute.xlu1 %2172  ;;  %v268_v5 = vadd.s32 24, %v2634_v2  ;;  %vm917_vm4 = vcmp.ge.s32.totalorder %v2881_v57, 15 }
  0xf5   : > { %2059 = vmatprep.mubr.bf16.mxu0 %v1111_v12  ;;  %v2178_v8 = vpop.permute.xlu0 %2177  ;;  %v1112_v15 = vpack.c.bf16 %v1100_v34, %v1099_v29  ;;  %v2175_v10 = vunpack.i.h.bf16 %v2173_v7  ;;  %v2174_v11 = vunpack.i.l.bf16 %v2173_v7  ;;  %v2889_v29 = vand.u32 15, %v271_v50 }
  0xf6   : > { %v1113_v14 = vpack.c.bf16 %v1102_v42, %v1101_v39  ;;  %v2180_v17 = vunpack.i.h.bf16 %v2178_v8  ;;  %v2179_v22 = vunpack.i.l.bf16 %v2178_v8  ;;  %v270_v7 = vadd.s32 40, %v2634_v2 }
  0xf7   : > { %v1104_v54 = vmax.f32 %v2773_v18, %v2175_v10  ;;  %v1103_v48 = vmax.f32 %v2770_v16, %v2174_v11  ;;  %vm857_vm5 = vcmp.lt.s32.totalorder %v2889_v29, 1 }
  0xf8   : > { %1320 = vmatmul.mubr.bf16.gmra.mrb[20].mxu1 %v1110_v59  ;;  %v1106_v0 = vmax.f32 %v2788_v31, %v2180_v17  ;;  %v1105_v63 = vmax.f32 %v2785_v30, %v2179_v22  ;;  %v2183_v19 = vpop.permute.xlu1 %2182 }
  0xf9   : > { %1329 = vmatprep.mubr.bf16.mxu1 %v2415_v1  ;;  %v1114_v21 = vpack.c.bf16 %v1104_v54, %v1103_v48  ;;  %v2185_v24 = vunpack.i.h.bf16 %v2183_v19  ;;  %v2184_v25 = vunpack.i.l.bf16 %v2183_v19 }
  0xfa   : > { %v1115_v27 = vpack.c.bf16 %v1106_v0, %v1105_v63  ;;  %v2908_v0 = vand.u32 15, %v268_v5 }
  0xfb   : > { %v1108_v26 = vmax.f32 %v2802_v43, %v2185_v24  ;;  %v1107_v18 = vmax.f32 %v2799_v41, %v2184_v25  ;;  %v267_v43 = vadd.s32 16, %v2634_v2 }
  0xfc   : > { %2060 = vmatmul.mubr.bf16.gmra.mrb[36].mxu0 %v1112_v15  ;;  %vm919_vm6 = vcmp.ge.s32.totalorder %v2908_v0, 15 }
  0xfd   : > { %2063 = vmatprep.mubr.bf16.mxu0 %v1113_v14  ;;  %v1116_v16 = vpack.c.bf16 %v1108_v26, %v1107_v18 }
 0x100   : > { %1330 = vmatmul.mubr.bf16.gmra.mrb[24].mxu1 %v1111_v12 }
 0x101   : > { %1339 = vmatprep.mubr.bf16.mxu1 %v2415_v1 }
 0x104   : > { %2064 = vmatmul.mubr.bf16.gmra.mrb[40].mxu0 %v1114_v21 }
 0x105   : > { %2067 = vmatprep.mubr.bf16.mxu0 %v1115_v27 }
 0x108   : > { %1340 = vmatmul.mubr.bf16.gmra.mrb[28].mxu1 %v1112_v15 }
 0x109   : > { %1349 = vmatprep.mubr.bf16.mxu1 %v2415_v1 }
 0x10c   : > { %2068 = vmatmul.mubr.bf16.gmra.mrb[44].mxu0 %v1116_v16 }
 0x110   : > { %1350 = vmatmul.mubr.bf16.gmra.mrb[32].mxu1 %v1113_v14  ;;  %v273_v14 = vadd.s32 64, %v2634_v2 }
 0x111   : > { %1359 = vmatprep.mubr.bf16.mxu1 %v2415_v1 }
 0x118   : > { %1360 = vmatmul.mubr.bf16.gmra.mrb[36].mxu1 %v1114_v21  ;;  %v2910_v21 = vand.u32 15, %v270_v7 }
 0x119   : > { %1369 = vmatprep.mubr.bf16.mxu1 %v2415_v1 }
 0x11a   : > { %vm921_vm7 = vcmp.ge.s32.totalorder %v2910_v21, 15 }
 0x120   : > { %1370 = vmatmul.mubr.bf16.gmra.mrb[40].mxu1 %v1115_v27 }
 0x121   : > { %1379 = vmatprep.mubr.bf16.mxu1 %v2415_v1  ;;  %v2866_v1 = vand.u32 15, %v267_v43 }
 0x123   : > { %vm853_vm2 = vcmp.lt.s32.totalorder %v2866_v1, 1 }
 0x128   : > { %1380 = vmatmul.mubr.bf16.gmra.mrb[44].mxu1 %v1116_v16  ;;  %v2915_v16 = vand.u32 15, %v273_v14 }
 0x12a   : > { %vm859_vm8 = vcmp.lt.s32.totalorder %v2915_v16, 1 }
 0x161   : > { %v2855_v30 = vpop.f32.mrb[0].mxu0 }
 0x162   : > { %v867_v31 = vrot.slane %v2855_v30, 7  ;;  %v2858_v41 = vpop.f32.mrb[1].mxu0 }
 0x163   : > { %v679_v32 = vpop.f32.mrb[2].mxu0 }
 0x164   : > { %v868_v28 = vrot.slane %v679_v32, 7  ;;  %v681_v33 = vpop.f32.mrb[3].mxu0 }
 0x166   : > { %v898_v36 = vsel %vm883_vm1, %v867_v31, %v868_v28 }
 0x167   : > { %v982_v44 = vadd.f32 %v898_v36, %v681_v33 }
 0x169   : > { %v685_v35 = vpop.f32.mrb[4].mxu0 }
 0x16a   : > { %v869_v37 = vrot.slane %v685_v35, 7  ;;  %v687_v45 = vpop.f32.mrb[5].mxu0 }
 0x16b   : > { %v689_v55 = vpop.f32.mrb[6].mxu0  ;;  %v2025_v56 = vpop.f32.mrb[0].mxu1 }
 0x16c   : > { %v897_v3 = vsel %vm883_vm1, %v868_v28, %v869_v37  ;;  %v870_v38 = vrot.slane %v689_v55, 7  ;;  %v691_v40 = vpop.f32.mrb[7].mxu0  ;;  %v934_v23 = vrot.slane %v2025_v56, 1  ;;  %v2883_v20 = vpop.f32.mrb[1].mxu1  ;;  %v272_v28 = vadd.s32 56, %v2634_v2 }
 0x16d   : > { %v902_v4 = vsel %vm853_vm2, 0.0, %v897_v3  ;;  %v932_v62 = vrot.slane %v2883_v20, 1  ;;  %v2026_v12 = vpop.f32.mrb[2].mxu1  ;;  %v274_v3 = vadd.s32 72, %v2634_v2  ;;  %v279_v20 = vadd.s32 112, %v2634_v2 }
 0x16e   : > { %v983_v13 = vadd.f32 %v902_v4, %v687_v45  ;;  %v896_v46 = vsel %vm883_vm1, %v869_v37, %v870_v38  ;;  %v935_v42 = vrot.slane %v2026_v12, 1  ;;  %v791_v39 = vpop.f32.mrb[3].mxu1  ;;  %v2929_v50 = vand.u32 15, %v272_v28 }
 0x16f   : > { %v2877_v47 = vadd.f32 %v896_v46, %v691_v40  ;;  %v933_v10 = vrot.slane %v791_v39, 1  ;;  %v2945_v12 = vand.u32 15, %v274_v3 }
 0x170   : > { %v961_v17 = vsel %vm948_vm0, %v934_v23, %v935_v42  ;;  %vm923_vm9 = vcmp.ge.s32.totalorder %v2929_v50, 15 }
 0x171   : > { %v695_v49 = vpop.f32.mrb[8].mxu0  ;;  %v2898_v22 = vadd.f32 %v983_v13, %v961_v17  ;;  %v962_v54 = vsel %vm948_vm0, %v933_v10, %v934_v23  ;;  %v2906_v48 = vsel %vm948_vm0, %v932_v62, %v933_v10  ;;  %vm925_vm10 = vcmp.ge.s32.totalorder %v2945_v12, 15 }
 0x172   : > { %v871_v52 = vrot.slane %v695_v49, 7  ;;  %v697_v53 = vpop.f32.mrb[9].mxu0  ;;  %v966_v19 = vsel %vm917_vm4, 0.0, %v962_v54  ;;  %vm1584_vm4 = vcmp.lt.s32.totalorder %v2634_v2, 6 }
 0x173   : > { %v699_v58 = vpop.f32.mrb[10].mxu0  ;;  %v2913_v27 = vadd.f32 %v982_v44, %v966_v19  ;;  %v2029_v26 = vpop.f32.mrb[4].mxu1 }
 0x174   : > { %v895_v59 = vsel %vm883_vm1, %v870_v38, %v871_v52  ;;  %v872_v60 = vrot.slane %v699_v58, 7  ;;  %v701_v61 = vpop.f32.mrb[11].mxu0  ;;  %v938_v43 = vrot.slane %v2029_v26, 1  ;;  %v804_v32 = vpop.f32.mrb[5].mxu1 }
 0x175   : > { %v904_v34 = vsel %vm855_vm3, 0.0, %v895_v59  ;;  %v936_v37 = vrot.slane %v804_v32, 1  ;;  %v2030_v45 = vpop.f32.mrb[6].mxu1  ;;  %v275_v59 = vadd.s32 80, %v2634_v2  ;;  %vm1519_vm3 = vcmp.lt.s32.totalorder %v2634_v2, 2 }
 0x176   : > { %v985_v8 = vadd.f32 %v904_v34, %v697_v53  ;;  %v894_v15 = vsel %vm883_vm1, %v871_v52, %v872_v60  ;;  %v939_v44 = vrot.slane %v2030_v45, 1  ;;  %v807_v55 = vpop.f32.mrb[7].mxu1 }
 0x177   : > { %v986_v11 = vadd.f32 %v894_v15, %v701_v61  ;;  %v960_v4 = vsel %vm948_vm0, %v935_v42, %v936_v37  ;;  %v937_v13 = vrot.slane %v807_v55, 1 }
 0x178   : > { %v968_v9 = vsel %vm919_vm6, 0.0, %v960_v4  ;;  %v957_v49 = vsel %vm948_vm0, %v938_v43, %v939_v44  ;;  %vm1489_vm6 = vcmp.lt.s32.totalorder %v2866_v1, 2 }
 0x179   : > { %v705_v63 = vpop.f32.mrb[12].mxu0  ;;  %v2932_v52 = vadd.f32 %v2877_v47, %v968_v9  ;;  %v958_v56 = vsel %vm948_vm0, %v937_v13, %v938_v43  ;;  %v959_v58 = vsel %vm948_vm0, %v936_v37, %v937_v13 }
 0x17a   : > { %v873_v24 = vrot.slane %v705_v63, 7  ;;  %v707_v25 = vpop.f32.mrb[13].mxu0  ;;  %v2943_v61 = vadd.f32 %v985_v8, %v959_v58  ;;  %v276_v63 = vadd.s32 88, %v2634_v2 }
 0x17b   : > { %v709_v18 = vpop.f32.mrb[14].mxu0  ;;  %v2033_v42 = vpop.f32.mrb[8].mxu1 }
 0x17c   : > { %v893_v33 = vsel %vm883_vm1, %v872_v60, %v873_v24  ;;  %v874_v36 = vrot.slane %v709_v18, 7  ;;  %v711_v35 = vpop.f32.mrb[15].mxu0  ;;  %v970_v60 = vsel %vm921_vm7, 0.0, %v958_v56  ;;  %v942_v7 = vrot.slane %v2033_v42, 1  ;;  %v820_v15 = vpop.f32.mrb[9].mxu1 }
 0x17d   : > { %v906_v51 = vsel %vm857_vm5, 0.0, %v893_v33  ;;  %v2948_v34 = vadd.f32 %v986_v11, %v970_v60  ;;  %v940_v17 = vrot.slane %v820_v15, 1  ;;  %v2034_v54 = vpop.f32.mrb[10].mxu1  ;;  %vm1553_vm5 = vcmp.ge.s32.totalorder %v2881_v57, 14 }
 0x17e   : > { %v987_v38 = vadd.f32 %v906_v51, %v707_v25  ;;  %v892_v40 = vsel %vm883_vm1, %v873_v24, %v874_v36  ;;  %v2954_v24 = vand.u32 15, %v275_v59  ;;  %v943_v11 = vrot.slane %v2034_v54, 1  ;;  %v823_v25 = vpop.f32.mrb[11].mxu1 }
 0x17f   : > { %v988_v46 = vadd.f32 %v892_v40, %v711_v35  ;;  %v956_v43 = vsel %vm948_vm0, %v939_v44, %v940_v17  ;;  %v941_v32 = vrot.slane %v823_v25, 1  ;;  %v2971_v51 = vand.u32 15, %v276_v63 }
 0x180   : > { %v2934_v53 = vadd.f32 %v987_v38, %v957_v49  ;;  %v972_v33 = vsel %vm923_vm9, 0.0, %v956_v43  ;;  %v277_v44 = vadd.s32 96, %v2634_v2  ;;  %v278_v40 = vadd.s32 104, %v2634_v2 }
 0x181   : > { %v715_v23 = vpop.f32.mrb[16].mxu0  ;;  %v2965_v35 = vadd.f32 %v988_v46, %v972_v33  ;;  %v954_v37 = vsel %vm948_vm0, %v941_v32, %v942_v7  ;;  %v955_v45 = vsel %vm948_vm0, %v940_v17, %v941_v32  ;;  %vm861_vm11 = vcmp.lt.s32.totalorder %v2954_v24, 1 }
 0x182   : > { %v875_v47 = vrot.slane %v715_v23, 7  ;;  %v717_v5 = vpop.f32.mrb[17].mxu0  ;;  %v974_v3 = vsel %vm925_vm10, 0.0, %v954_v37  ;;  %vm927_vm12 = vcmp.ge.s32.totalorder %v2971_v51, 15  ;;  %v2985_v15 = vand.u32 15, %v278_v40 }
 0x183   : > { %v719_v39 = vpop.f32.mrb[18].mxu0  ;;  %v2037_v9 = vpop.f32.mrb[12].mxu1  ;;  %vm1491_vm9 = vcmp.lt.s32.totalorder %v2874_v6, 2 }
 0x184   : > { %v891_v10 = vsel %vm883_vm1, %v874_v36, %v875_v47  ;;  %v876_v14 = vrot.slane %v719_v39, 7  ;;  %v721_v8 = vpop.f32.mrb[19].mxu0  ;;  %v953_v36 = vsel %vm948_vm0, %v942_v7, %v943_v11  ;;  %v946_v56 = vrot.slane %v2037_v9, 1  ;;  %v836_v58 = vpop.f32.mrb[13].mxu1 }
 0x185   : > { %v908_v19 = vsel %vm859_vm8, 0.0, %v891_v10  ;;  %v2983_v39 = vand.u32 15, %v277_v44  ;;  %vm929_vm14 = vcmp.ge.s32.totalorder %v2985_v15, 15  ;;  %vm1555_vm8 = vcmp.ge.s32.totalorder %v2908_v0, 14 }
 0x186   : > { %v989_v26 = vadd.f32 %v908_v19, %v717_v5  ;;  %v890_v18 = vsel %vm883_vm1, %v875_v47, %v876_v14  ;;  %v944_v47 = vrot.slane %v836_v58, 1  ;;  %v2038_v5 = vpop.f32.mrb[14].mxu1  ;;  %v3018_v58 = vand.u32 15, %v2634_v2 }
 0x187   : > { %v990_v28 = vadd.f32 %v890_v18, %v721_v8  ;;  %v947_v7 = vrot.slane %v2038_v5, 1  ;;  %v839_v10 = vpop.f32.mrb[15].mxu1  ;;  %vm863_vm13 = vcmp.lt.s32.totalorder %v2983_v39, 1 }
 0x188   : > { %v2974_v38 = vadd.f32 %v989_v26, %v955_v45  ;;  %v945_v54 = vrot.slane %v839_v10, 1  ;;  %vm851_vm2 = vcmp.lt.s32.totalorder %v3018_v58, 1 }
 0x189   : > { %v725_v55 = vpop.f32.mrb[20].mxu0  ;;  %v2978_v46 = vadd.f32 %v990_v28, %v974_v3  ;;  %v949_v25 = vsel %vm948_vm0, %v946_v56, %v947_v7  ;;  %v964_v26 = vsel %vm948_vm0, %v947_v7, %v932_v62  ;;  %v280_v62 = vadd.s32 120, %v2634_v2 }
 0x18a   : > { %v877_v4 = vrot.slane %v725_v55, 7  ;;  %v727_v13 = vpop.f32.mrb[21].mxu0  ;;  %v950_v43 = vsel %vm948_vm0, %v945_v54, %v946_v56  ;;  %v951_v32 = vsel %vm948_vm0, %v944_v47, %v945_v54 }
 0x18b   : > { %v729_v49 = vpop.f32.mrb[22].mxu0  ;;  %v978_v9 = vsel %vm929_vm14, 0.0, %v950_v43  ;;  %v3015_v56 = vand.u32 15, %v280_v62  ;;  %vm1559_vm14 = vcmp.ge.s32.totalorder %v2929_v50, 14 }
 0x18c   : > { %v889_v23 = vsel %vm883_vm1, %v876_v14, %v877_v4  ;;  %v878_v59 = vrot.slane %v729_v49, 7  ;;  %v731_v60 = vpop.f32.mrb[23].mxu0  ;;  %v952_v14 = vsel %vm948_vm0, %v943_v11, %v944_v47 }
 0x18d   : > { %v910_v42 = vsel %vm861_vm11, 0.0, %v889_v23  ;;  %v976_v19 = vsel %vm927_vm12, 0.0, %v952_v14  ;;  %vm931_vm0 = vcmp.ge.s32.totalorder %v3015_v56, 15  ;;  %vm1557_vm11 = vcmp.ge.s32.totalorder %v2910_v21, 14 }
 0x18e   : > { %v991_v8 = vadd.f32 %v910_v42, %v727_v13  ;;  %v888_v17 = vsel %vm883_vm1, %v877_v4, %v878_v59  ;;  %v3013_v13 = vand.u32 15, %v279_v20 }
 0x18f   : > { %v992_v63 = vadd.f32 %v888_v17, %v731_v60 }
 0x190   : > { %v2997_v18 = vadd.f32 %v991_v8, %v953_v36  ;;  %vm865_vm15 = vcmp.lt.s32.totalorder %v3013_v13, 1 }
 0x191   : > { %v735_v11 = vpop.f32.mrb[24].mxu0  ;;  %v3003_v28 = vadd.f32 %v992_v63, %v976_v19  ;;  %v980_v19 = vsel %vm931_vm0, 0.0, %v964_v26  ;;  %vm1561_vm0 = vcmp.ge.s32.totalorder %v2945_v12, 14 }
 0x192   : > { %v879_v33 = vrot.slane %v735_v11, 7  ;;  %v737_v37 = vpop.f32.mrb[25].mxu0 }
 0x193   : > { %v739_v45 = vpop.f32.mrb[26].mxu0 }
 0x194   : > { %v887_v36 = vsel %vm883_vm1, %v878_v59, %v879_v33  ;;  %v880_v55 = vrot.slane %v739_v45, 7  ;;  %v741_v44 = vpop.f32.mrb[27].mxu0 }
 0x195   : > { %v912_v3 = vsel %vm863_vm13, 0.0, %v887_v36  ;;  %vm1493_vm13 = vcmp.lt.s32.totalorder %v2889_v29, 2 }
 0x196   : > { %v993_v40 = vadd.f32 %v912_v3, %v737_v37  ;;  %v886_v4 = vsel %vm883_vm1, %v879_v33, %v880_v55 }
 0x197   : > { %v994_v49 = vadd.f32 %v886_v4, %v741_v44 }
 0x198   : > { %v3020_v23 = vadd.f32 %v993_v40, %v951_v32 }
 0x199   : > { %v745_v60 = vpop.f32.mrb[28].mxu0  ;;  %v3022_v59 = vadd.f32 %v994_v49, %v978_v9 }
 0x19a   : > { %v881_v47 = vrot.slane %v745_v60, 7  ;;  %v747_v5 = vpop.f32.mrb[29].mxu0 }
 0x19b   : > { %v749_v42 = vpop.f32.mrb[30].mxu0 }
 0x19c   : > { %v885_v7 = vsel %vm883_vm1, %v880_v55, %v881_v47  ;;  %v882_v10 = vrot.slane %v749_v42, 7  ;;  %v751_v8 = vpop.f32.mrb[31].mxu0 }
 0x19d   : > { %v914_v17 = vsel %vm865_vm15, 0.0, %v885_v7  ;;  %v1651_v7 = vand.u32 1, %v2866_v1  ;;  %v1653_v1 = vand.u32 1, %v2874_v6 }
 0x19e   : > { %v995_v14 = vadd.f32 %v914_v17, %v747_v5  ;;  %v899_v54 = vsel %vm883_vm1, %v882_v10, %v867_v31  ;;  %v884_v63 = vsel %vm883_vm1, %v881_v47, %v882_v10 }
 0x19f   : > { %v900_v43 = vsel %vm851_vm2, 0.0, %v899_v54  ;;  %v996_v32 = vadd.f32 %v884_v63, %v751_v8  ;;  %vm3076_vm7 = vcmp.eq.s32.totalorder %v1651_v7, 1  ;;  %vm3093_vm12 = vcmp.eq.s32.totalorder %v1653_v1, 1 }
 0x1a0   : > { %v981_v11 = vadd.f32 %v900_v43, %v2858_v41  ;;  %v3036_v33 = vadd.f32 %v995_v14, %v949_v25  ;;  %v1652_v43 = vand.u32 1, %v2908_v0 }
 0x1a1   : > { %v3038_v37 = vadd.f32 %v996_v32, %v980_v19 }
 0x1a2   : > { %v3041_v20 = vadd.f32 %v981_v11, %v2906_v48  ;;  %vm3084_vm10 = vcmp.eq.s32.totalorder %v1652_v43, 1 }
 0x1a3   : > { %3473 = vst [vmem:[#allocation12_spill] sm:$0xff] %v3038_v37 }
 0x1a4   : > { %3474 = vst [vmem:[#allocation13_spill] sm:$0xff] %v3041_v20 }
 0x1c3   : > { %v3043_v45 = vpop.f32.mrb[16].mxu1 }
 0x1c4   : > { %v3045_v30 = vpop.f32.mrb[17].mxu1  ;;  %v3461_v26 = vrot.slane %v3043_v45, 6 }
 0x1c5   : > { %v1315_v31 = vpop.f32.mrb[18].mxu1 }
 0x1c6   : > { %v1504_v62 = vrot.slane %v1315_v31, 6  ;;  %v1317_v36 = vpop.f32.mrb[19].mxu1 }
 0x1c7   : > { %v2057_v55 = vpop.f32.mrb[32].mxu0 }
 0x1c8   : > { %v1534_v41 = vsel %vm1519_vm3, %v3461_v26, %v1504_v62  ;;  %v1570_v25 = vrot.slane %v2057_v55, 2  ;;  %v3053_v48 = vpop.f32.mrb[33].mxu0 }
 0x1c9   : > { %v1618_v44 = vadd.f32 %v1534_v41, %v1317_v36  ;;  %v3462_v3 = vrot.slane %v3053_v48, 2  ;;  %v2058_v40 = vpop.f32.mrb[34].mxu0 }
 0x1ca   : > { %v1571_v4 = vrot.slane %v2058_v40, 2  ;;  %v1427_v9 = vpop.f32.mrb[35].mxu0 }
 0x1cb   : > { %v1569_v49 = vrot.slane %v1427_v9, 2  ;;  %v1321_v60 = vpop.f32.mrb[20].mxu1 }
 0x1cc   : > { %v1505_v47 = vrot.slane %v1321_v60, 6  ;;  %v1323_v5 = vpop.f32.mrb[21].mxu1  ;;  %v1597_v42 = vsel %vm1584_vm4, %v1570_v25, %v1571_v4 }
 0x1cd   : > { %v1598_v10 = vsel %vm1584_vm4, %v1569_v49, %v1570_v25  ;;  %v3068_v8 = vsel %vm1584_vm4, %v3462_v3, %v1569_v49  ;;  %v1325_v17 = vpop.f32.mrb[22].mxu1 }
 0x1ce   : > { %v1602_v14 = vsel %vm1553_vm5, 0.0, %v1598_v10  ;;  %v1533_v54 = vsel %vm1519_vm3, %v1504_v62, %v1505_v47  ;;  %v1506_v63 = vrot.slane %v1325_v17, 6  ;;  %v1327_v19 = vpop.f32.mrb[23].mxu1  ;;  %vm1495_vm5 = vcmp.lt.s32.totalorder %v2915_v16, 2 }
 0x1cf   : > { %v3074_v32 = vadd.f32 %v1618_v44, %v1602_v14  ;;  %v1538_v11 = vsel %vm1489_vm6, 0.0, %v1533_v54  ;;  %v2061_v31 = vpop.f32.mrb[36].mxu0  ;;  %v1654_v54 = vand.u32 1, %v2910_v21 }
 0x1d0   : > { %v1619_v36 = vadd.f32 %v1538_v11, %v1323_v5  ;;  %v1532_v41 = vsel %vm1519_vm3, %v1505_v47, %v1506_v63  ;;  %v1440_v25 = vpop.f32.mrb[37].mxu0  ;;  %v1574_v40 = vrot.slane %v2061_v31, 2 }
 0x1d1   : > { %v1620_v62 = vadd.f32 %v1532_v41, %v1327_v19  ;;  %v1572_v9 = vrot.slane %v1440_v25, 2  ;;  %v2062_v44 = vpop.f32.mrb[38].mxu0  ;;  %v3460_v47 = vrot.slane %v3074_v32, 7  ;;  %vm3139_vm15 = vcmp.eq.s32.totalorder %v1654_v54, 1 }
 0x1d2   : > { %v1635_v49 = vadd.f32 %v1619_v36, %v1597_v42  ;;  %v1575_v5 = vrot.slane %v2062_v44, 2  ;;  %v1443_v7 = vpop.f32.mrb[39].mxu0 }
 0x1d3   : > { %v1596_v10 = vsel %vm1584_vm4, %v1571_v4, %v1572_v9  ;;  %v1331_v17 = vpop.f32.mrb[24].mxu1  ;;  %v1573_v14 = vrot.slane %v1443_v7, 2 }
 0x1d4   : > { %v1683_v42 = vrot.slane %v1635_v49, 7  ;;  %v1604_v43 = vsel %vm1555_vm8, 0.0, %v1596_v10  ;;  %v1507_v11 = vrot.slane %v1331_v17, 6  ;;  %v1333_v31 = vpop.f32.mrb[25].mxu1  ;;  %v3101_v36 = vsel %vm1584_vm4, %v1574_v40, %v1575_v5 }
 0x1d5   : > { %v1636_v41 = vadd.f32 %v1620_v62, %v1604_v43  ;;  %v1335_v4 = vpop.f32.mrb[26].mxu1  ;;  %v1594_v25 = vsel %vm1584_vm4, %v1573_v14, %v1574_v40  ;;  %v1595_v1 = vsel %vm1584_vm4, %v1572_v9, %v1573_v14  ;;  %v1655_v62 = vand.u32 1, %v2889_v29  ;;  %v3120_v9 = vld [vmem:[%s3455_s3] ss:$0 sm:$0xff] }
 0x1d6   : > { %v1710_v0 = vsel %vm883_vm1, %v3460_v47, %v1683_v42  ;;  %v1531_v44 = vsel %vm1519_vm3, %v1506_v63, %v1507_v11  ;;  %v1508_v7 = vrot.slane %v1335_v4, 6  ;;  %v1337_v10 = vpop.f32.mrb[27].mxu1  ;;  %v1656_v63 = vand.u32 1, %v2929_v50 }
 0x1d7   : > { %v1715_v40 = vsel %vm3076_vm7, %v1710_v0, %v1635_v49  ;;  %v1684_v17 = vrot.slane %v1636_v41, 7  ;;  %v1540_v14 = vsel %vm1491_vm9, 0.0, %v1531_v44  ;;  %v3124_v43 = vpop.f32.mrb[40].mxu0  ;;  %v1606_v49 = vsel %vm1557_vm11, 0.0, %v1594_v25 }
 0x1d8   : > { %v1731_v4 = vadd.f32 %v1715_v40, %v2898_v22  ;;  %v1621_v47 = vadd.f32 %v1540_v14, %v1333_v31  ;;  %v1530_v55 = vsel %vm1519_vm3, %v1507_v11, %v1508_v7  ;;  %v1456_v0 = vpop.f32.mrb[41].mxu0  ;;  %v1578_v26 = vrot.slane %v3124_v43, 2 }
 0x1d9   : > { %v1709_v6 = vsel %vm883_vm1, %v1683_v42, %v1684_v17  ;;  %v1622_v44 = vadd.f32 %v1530_v55, %v1337_v10  ;;  %v1576_v3 = vrot.slane %v1456_v0, 2  ;;  %v2066_v37 = vpop.f32.mrb[42].mxu0  ;;  %vm3149_vm2 = vcmp.eq.s32.totalorder %v1655_v62, 1 }
 0x1da   : > { %v1754_v20 = vadd.f32 %v3120_v9, %v1731_v4  ;;  %v1716_v22 = vsel %vm3084_vm10, %v1709_v6, %v1636_v41  ;;  %v1637_v31 = vadd.f32 %v1621_v47, %v1595_v1  ;;  %v1459_v21 = vpop.f32.mrb[43].mxu0  ;;  %vm3157_vm6 = vcmp.eq.s32.totalorder %v1656_v63, 1 }
 0x1db   : > { %v1732_v25 = vadd.f32 %v1716_v22, %v2932_v52  ;;  %v3144_v40 = vadd.f32 %v1622_v44, %v1606_v49  ;;  %v1341_v42 = vpop.f32.mrb[28].mxu1  ;;  %v1592_v10 = vsel %vm1584_vm4, %v1575_v5, %v1576_v3  ;;  %v1577_v14 = vrot.slane %v1459_v21, 2 }
 0x1dc   : > { %v1770_v60 = vmax.f32 %v1754_v20, 0.0  ;;  %v1685_v41 = vrot.slane %v1637_v31, 7  ;;  %v1509_v47 = vrot.slane %v1341_v42, 6  ;;  %v1343_v54 = vpop.f32.mrb[29].mxu1  ;;  %v1657_v52 = vand.u32 1, %v2915_v16 }
 0x1dd   : > { %v1755_v43 = vadd.f32 %v3120_v9, %v1732_v25  ;;  %v1686_v5 = vrot.slane %v3144_v40, 7  ;;  %v1345_v4 = vpop.f32.mrb[30].mxu1  ;;  %v3163_v20 = vsel %vm1584_vm4, %v1576_v3, %v1577_v14  ;;  %v1590_v62 = vsel %vm1584_vm4, %v1577_v14, %v1578_v26 }
 0x1de   : > { %1786 = vst [vmem:[%s3169_s30 + $0x10] sm:$0xff] %v1770_v60  ;;  %v1708_v49 = vsel %vm883_vm1, %v1684_v17, %v1685_v41  ;;  %v1529_v63 = vsel %vm1519_vm3, %v1508_v7, %v1509_v47  ;;  %v1510_v0 = vrot.slane %v1345_v4, 6  ;;  %v1579_v6 = vrot.slane %v2066_v37, 2  ;;  %v1347_v44 = vpop.f32.mrb[31].mxu1 }
 0x1df   : > { %v1771_v3 = vmax.f32 %v1755_v43, 0.0  ;;  %v1707_v22 = vsel %vm883_vm1, %v1685_v41, %v1686_v5  ;;  %v1717_v21 = vsel %vm3093_vm12, %v1708_v49, %v1637_v31  ;;  %v1542_v25 = vsel %vm1493_vm13, 0.0, %v1529_v63  ;;  %v2069_v42 = vpop.f32.mrb[44].mxu0 }
 0x1e0   : > { %v1718_v17 = vsel %vm3139_vm15, %v1707_v22, %v3144_v40  ;;  %v1733_v7 = vadd.f32 %v1717_v21, %v2943_v61  ;;  %v1623_v14 = vadd.f32 %v1542_v25, %v1343_v54  ;;  %v1528_v37 = vsel %vm1519_vm3, %v1509_v47, %v1510_v0  ;;  %v1472_v60 = vpop.f32.mrb[45].mxu0 }
 0x1e1   : > { %1787 = vst [vmem:[%s3169_s30 + $0x18] sm:$0xff] %v1771_v3  ;;  %v1734_v41 = vadd.f32 %v1718_v17, %v2948_v34  ;;  %v1624_v19 = vadd.f32 %v1528_v37, %v1347_v44  ;;  %v1582_v31 = vrot.slane %v2069_v42, 2  ;;  %v1580_v43 = vrot.slane %v1472_v60, 2  ;;  %v2070_v29 = vpop.f32.mrb[46].mxu0 }
 0x1e2   : > { %v1756_v4 = vadd.f32 %v3120_v9, %v1733_v7  ;;  %v1639_v49 = vadd.f32 %v1623_v14, %v3101_v36  ;;  %v1608_v11 = vsel %vm1559_vm14, 0.0, %v1592_v10  ;;  %v3196_v61 = vsel %vm1584_vm4, %v1578_v26, %v1579_v6  ;;  %v1475_v40 = vpop.f32.mrb[47].mxu0 }
 0x1e3   : > { %v1757_v47 = vadd.f32 %v3120_v9, %v1734_v41  ;;  %v1640_v34 = vadd.f32 %v1624_v19, %v1608_v11  ;;  %v1351_v54 = vpop.f32.mrb[32].mxu1  ;;  %v3201_v63 = vsel %vm1584_vm4, %v1579_v6, %v1580_v43  ;;  %v1581_v44 = vrot.slane %v1475_v40, 2 }
 0x1e4   : > { %v1772_v3 = vmax.f32 %v1756_v4, 0.0  ;;  %v1687_v36 = vrot.slane %v1639_v49, 7  ;;  %v1583_v50 = vrot.slane %v2070_v29, 2  ;;  %v1511_v10 = vrot.slane %v1351_v54, 6  ;;  %v1353_v22 = vpop.f32.mrb[33].mxu1 }
 0x1e5   : > { %v1773_v21 = vmax.f32 %v1757_v47, 0.0  ;;  %v1688_v26 = vrot.slane %v1640_v34, 7  ;;  %v1355_v25 = vpop.f32.mrb[34].mxu1  ;;  %v3205_v42 = vsel %vm1584_vm4, %v1581_v44, %v1582_v31  ;;  %v3209_v17 = vsel %vm1584_vm4, %v1580_v43, %v1581_v44 }
 0x1e6   : > { %1788 = vst [vmem:[%s3169_s30 + $0x20] sm:$0xff] %v1772_v3  ;;  %v1706_v6 = vsel %vm883_vm1, %v1686_v5, %v1687_v36  ;;  %v1527_v7 = vsel %vm1519_vm3, %v1510_v0, %v1511_v10  ;;  %v1512_v14 = vrot.slane %v1355_v25, 6  ;;  %v1357_v37 = vpop.f32.mrb[35].mxu1  ;;  %v1610_v60 = vsel %vm1561_vm0, 0.0, %v1590_v62 }
 0x1e7   : > { %1789 = vst [vmem:[%s3169_s30 + $0x28] sm:$0xff] %v1773_v21  ;;  %v1719_v41 = vsel %vm3149_vm2, %v1706_v6, %v1639_v49  ;;  %v1705_v19 = vsel %vm883_vm1, %v1687_v36, %v1688_v26  ;;  %v1544_v43 = vsel %vm1495_vm5, 0.0, %v1527_v7  ;;  %v3227_v5 = vsel %vm1584_vm4, %v1582_v31, %v1583_v50 }
 0x1e8   : > { %v1735_v0 = vadd.f32 %v1719_v41, %v2934_v53  ;;  %v1720_v29 = vsel %vm3157_vm6, %v1705_v19, %v1640_v34  ;;  %v1625_v62 = vadd.f32 %v1544_v43, %v1353_v22  ;;  %v1526_v1 = vsel %vm1519_vm3, %v1511_v10, %v1512_v14 }
 0x1e9   : > { %v1736_v4 = vadd.f32 %v1720_v29, %v2965_v35  ;;  %v1626_v49 = vadd.f32 %v1526_v1, %v1357_v37  ;;  %v1658_v11 = vand.u32 1, %v2945_v12  ;;  %v3487_v40 = vrot.slane %v3053_v48, 2 }
 0x1ea   : > { %v1758_v53 = vadd.f32 %v3120_v9, %v1735_v0  ;;  %v1641_v55 = vadd.f32 %v1625_v62, %v3163_v20  ;;  %vm3247_vm7 = vcmp.eq.s32.totalorder %v1657_v52, 1  ;;  %vm1563_vm9 = vcmp.ge.s32.totalorder %v2971_v51, 14 }
 0x1eb   : > { %v3240_v31 = vsel %vm1584_vm4, %v1583_v50, %v3487_v40  ;;  %v1759_v47 = vadd.f32 %v3120_v9, %v1736_v4  ;;  %v1642_v12 = vadd.f32 %v1626_v49, %v1610_v60  ;;  %v1361_v34 = vpop.f32.mrb[36].mxu1  ;;  %vm1497_vm4 = vcmp.lt.s32.totalorder %v2954_v24, 2 }
 0x1ec   : > { %v1774_v48 = vmax.f32 %v1758_v53, 0.0  ;;  %v1689_v54 = vrot.slane %v1641_v55, 7  ;;  %v1513_v44 = vrot.slane %v1361_v34, 6  ;;  %v1363_v3 = vpop.f32.mrb[37].mxu1  ;;  %vm3252_vm8 = vcmp.eq.s32.totalorder %v1658_v11, 1 }
 0x1ed   : > { %v1775_v36 = vmax.f32 %v1759_v47, 0.0  ;;  %v1690_v50 = vrot.slane %v1642_v12, 7  ;;  %v1365_v16 = vpop.f32.mrb[38].mxu1  ;;  %v1659_v37 = vand.u32 1, %v2954_v24  ;;  %v1660_v0 = vand.u32 1, %v2971_v51 }
 0x1ee   : > { %1790 = vst [vmem:[%s3169_s30 + $0x30] sm:$0xff] %v1774_v48  ;;  %v1704_v52 = vsel %vm883_vm1, %v1688_v26, %v1689_v54  ;;  %v1525_v10 = vsel %vm1519_vm3, %v1512_v14, %v1513_v44  ;;  %v1514_v22 = vrot.slane %v1365_v16, 6  ;;  %v1367_v21 = vpop.f32.mrb[39].mxu1  ;;  %v1612_v24 = vsel %vm1563_vm9, 0.0, %v3201_v63 }
 0x1ef   : > { %1791 = vst [vmem:[%s3169_s30 + $0x38] sm:$0xff] %v1775_v36  ;;  %v1721_v25 = vsel %vm3247_vm7, %v1704_v52, %v1641_v55  ;;  %v1703_v6 = vsel %vm883_vm1, %v1689_v54, %v1690_v50  ;;  %v1546_v7 = vsel %vm1497_vm4, 0.0, %v1525_v10  ;;  %vm3279_vm10 = vcmp.eq.s32.totalorder %v1659_v37, 1 }
 0x1f0   : > { %v1737_v60 = vadd.f32 %v1721_v25, %v2974_v38  ;;  %v1722_v26 = vsel %vm3252_vm8, %v1703_v6, %v1642_v12  ;;  %v1627_v14 = vadd.f32 %v1546_v7, %v1363_v3  ;;  %v1524_v41 = vsel %vm1519_vm3, %v1513_v44, %v1514_v22 }
 0x1f1   : > { %v1738_v19 = vadd.f32 %v1722_v26, %v2978_v46  ;;  %v1628_v43 = vadd.f32 %v1524_v41, %v1367_v21  ;;  %vm1499_vm11 = vcmp.lt.s32.totalorder %v2983_v39, 2  ;;  %vm1565_vm12 = vcmp.ge.s32.totalorder %v2985_v15, 14 }
 0x1f2   : > { %v1760_v29 = vadd.f32 %v3120_v9, %v1737_v60  ;;  %v1643_v62 = vadd.f32 %v1627_v14, %v3196_v61  ;;  %vm3285_vm13 = vcmp.eq.s32.totalorder %v1660_v0, 1  ;;  %v1661_v47 = vand.u32 1, %v2983_v39 }
 0x1f3   : > { %v1761_v38 = vadd.f32 %v3120_v9, %v1738_v19  ;;  %v1644_v4 = vadd.f32 %v1628_v43, %v1612_v24  ;;  %v1371_v49 = vpop.f32.mrb[40].mxu1  ;;  %v1614_v36 = vsel %vm1565_vm12, 0.0, %v3205_v42  ;;  %v1662_v21 = vand.u32 1, %v2985_v15 }
 0x1f4   : > { %v1776_v46 = vmax.f32 %v1760_v29, 0.0  ;;  %v1691_v51 = vrot.slane %v1643_v62, 7  ;;  %v1515_v11 = vrot.slane %v1371_v49, 6  ;;  %v1373_v40 = vpop.f32.mrb[41].mxu1  ;;  %v1650_v25 = vand.u32 1, %v2881_v57 }
 0x1f5   : > { %v1777_v61 = vmax.f32 %v1761_v38, 0.0  ;;  %v1692_v53 = vrot.slane %v1644_v4, 7  ;;  %v1375_v55 = vpop.f32.mrb[42].mxu1  ;;  %vm3314_vm14 = vcmp.eq.s32.totalorder %v1661_v47, 1  ;;  %vm1567_vm15 = vcmp.ge.s32.totalorder %v3015_v56, 14 }
 0x1f6   : > { %1792 = vst [vmem:[%s3169_s30 + $0x40] sm:$0xff] %v1776_v46  ;;  %v1702_v35 = vsel %vm883_vm1, %v1690_v50, %v1691_v51  ;;  %v1523_v12 = vsel %vm1519_vm3, %v1514_v22, %v1515_v11  ;;  %v1516_v34 = vrot.slane %v1375_v55, 6  ;;  %v1377_v48 = vpop.f32.mrb[43].mxu1  ;;  %vm1501_vm0 = vcmp.lt.s32.totalorder %v3013_v13, 2 }
 0x1f7   : > { %1793 = vst [vmem:[%s3169_s30 + $0x48] sm:$0xff] %v1777_v61  ;;  %v1723_v54 = vsel %vm3279_vm10, %v1702_v35, %v1643_v62  ;;  %v1701_v44 = vsel %vm883_vm1, %v1691_v51, %v1692_v53  ;;  %v1548_v3 = vsel %vm1499_vm11, 0.0, %v1523_v12  ;;  %vm3320_vm2 = vcmp.eq.s32.totalorder %v1662_v21, 1 }
 0x1f8   : > { %v1739_v20 = vadd.f32 %v1723_v54, %v2997_v18  ;;  %v1724_v50 = vsel %vm3285_vm13, %v1701_v44, %v1644_v4  ;;  %v1629_v16 = vadd.f32 %v1548_v3, %v1373_v40  ;;  %v1522_v52 = vsel %vm1519_vm3, %v1515_v11, %v1516_v34 }
 0x1f9   : > { %v1740_v10 = vadd.f32 %v1724_v50, %v3003_v28  ;;  %v1630_v22 = vadd.f32 %v1522_v52, %v1377_v48  ;;  %vm1487_vm5 = vcmp.lt.s32.totalorder %v3018_v58, 2  ;;  %v1663_v0 = vand.u32 1, %v3013_v13 }
 0x1fa   : > { %v1762_v39 = vadd.f32 %v3120_v9, %v1739_v20  ;;  %v1645_v42 = vadd.f32 %v1629_v16, %v3209_v17  ;;  %v1664_v4 = vand.u32 1, %v3015_v56  ;;  %v3500_v13 = vrot.slane %v3043_v45, 6 }
 0x1fb   : > { %v1763_v18 = vadd.f32 %v3120_v9, %v1740_v10  ;;  %v1646_v6 = vadd.f32 %v1630_v22, %v1614_v36  ;;  %v1381_v37 = vpop.f32.mrb[44].mxu1  ;;  %vm3354_vm6 = vcmp.eq.s32.totalorder %v1663_v0, 1  ;;  %v1616_v12 = vsel %vm1567_vm15, 0.0, %v3240_v31 }
 0x1fc   : > { %v1778_v28 = vmax.f32 %v1762_v39, 0.0  ;;  %v1693_v15 = vrot.slane %v1645_v42, 7  ;;  %v1517_v60 = vrot.slane %v1381_v37, 6  ;;  %v1383_v57 = vpop.f32.mrb[45].mxu1  ;;  %vm3366_vm7 = vcmp.eq.s32.totalorder %v1664_v4, 1  ;;  %v3508_v39 = vld [vmem:[#allocation13_spill] sm:$0xff] }
 0x1fd   : > { %v1779_v26 = vmax.f32 %v1763_v18, 0.0  ;;  %v1694_v14 = vrot.slane %v1646_v6, 7  ;;  %v1385_v41 = vpop.f32.mrb[46].mxu1  ;;  %v3507_v20 = vrot.slane %v3074_v32, 7  ;;  %v3509_v18 = vld [vmem:[#allocation12_spill] sm:$0xff] }
 0x1fe   : > { %1794 = vst [vmem:[%s3169_s30 + $0x50] sm:$0xff] %v1778_v28  ;;  %v1700_v19 = vsel %vm883_vm1, %v1692_v53, %v1693_v15  ;;  %v1521_v43 = vsel %vm1519_vm3, %v1516_v34, %v1517_v60  ;;  %v1518_v29 = vrot.slane %v1385_v41, 6  ;;  %v1387_v62 = vpop.f32.mrb[47].mxu1  ;;  %v1649_v53 = vand.u32 1, %v3018_v58 }
 0x1ff   : > { %1795 = vst [vmem:[%s3169_s30 + $0x58] sm:$0xff] %v1779_v26  ;;  %v1699_v24 = vsel %vm883_vm1, %v1693_v15, %v1694_v14  ;;  %v1725_v38 = vsel %vm3314_vm14, %v1700_v19, %v1645_v42  ;;  %v1550_v1 = vsel %vm1501_vm0, 0.0, %v1521_v43 }
 0x200   : > { %v1726_v49 = vsel %vm3320_vm2, %v1699_v24, %v1646_v6  ;;  %v1741_v46 = vadd.f32 %v1725_v38, %v3020_v23  ;;  %v1631_v51 = vadd.f32 %v1550_v1, %v1383_v57  ;;  %v1535_v11 = vsel %vm1519_vm3, %v1518_v29, %v3500_v13 }
 0x201   : > { %v1742_v40 = vadd.f32 %v1726_v49, %v3022_v59  ;;  %v1536_v61 = vsel %vm1487_vm5, 0.0, %v1535_v11  ;;  %v1520_v63 = vsel %vm1519_vm3, %v1517_v60, %v1518_v29  ;;  %vm3362_vm3 = vcmp.eq.s32.totalorder %v1650_v25, 1 }
 0x202   : > { %v1764_v55 = vadd.f32 %v3120_v9, %v1741_v46  ;;  %v1647_v23 = vadd.f32 %v1631_v51, %v3227_v5  ;;  %v1617_v45 = vadd.f32 %v1536_v61, %v3045_v30  ;;  %v1632_v47 = vadd.f32 %v1520_v63, %v1387_v62 }
 0x203   : > { %v1765_v35 = vadd.f32 %v3120_v9, %v1742_v40  ;;  %vm1665_vm4 = vcmp.eq.s32.totalorder %v1649_v53, 1 }
 0x204   : > { %v1780_v34 = vmax.f32 %v1764_v55, 0.0  ;;  %v1695_v58 = vrot.slane %v1647_v23, 7  ;;  %v1633_v48 = vadd.f32 %v1617_v45, %v3068_v8  ;;  %v1648_v54 = vadd.f32 %v1632_v47, %v1616_v12 }
 0x205   : > { %v1781_v30 = vmax.f32 %v1765_v35, 0.0 }
 0x206   : > { %1796 = vst [vmem:[%s3169_s30 + $0x60] sm:$0xff] %v1780_v34  ;;  %v1698_v3 = vsel %vm883_vm1, %v1694_v14, %v1695_v58  ;;  %v1681_v56 = vrot.slane %v1633_v48, 7  ;;  %v1696_v31 = vrot.slane %v1648_v54, 7 }
 0x207   : > { %1797 = vst [vmem:[%s3169_s30 + $0x68] sm:$0xff] %v1781_v30  ;;  %v1727_v8 = vsel %vm3354_vm6, %v1698_v3, %v1647_v23 }
 0x208   : > { %v1743_v36 = vadd.f32 %v1727_v8, %v3036_v33  ;;  %v1711_v50 = vsel %vm883_vm1, %v1681_v56, %v3507_v20  ;;  %v1697_v16 = vsel %vm883_vm1, %v1695_v58, %v1696_v31  ;;  %v1712_v52 = vsel %vm883_vm1, %v1696_v31, %v1681_v56 }
 0x209   : > { %v1714_v10 = vsel %vm3362_vm3, %v1711_v50, %v3074_v32  ;;  %v1713_v22 = vsel %vm1665_vm4, %v1712_v52, %v1633_v48  ;;  %v1728_v33 = vsel %vm3366_vm7, %v1697_v16, %v1648_v54 }
 0x20a   : > { %v1766_v21 = vadd.f32 %v3120_v9, %v1743_v36  ;;  %v1730_v25 = vadd.f32 %v1714_v10, %v2913_v27  ;;  %v1729_v42 = vadd.f32 %v1713_v22, %v3508_v39  ;;  %v1744_v2 = vadd.f32 %v1728_v33, %v3509_v18 }
 0x20c   : > { %v1782_v6 = vmax.f32 %v1766_v21, 0.0  ;;  %v1753_v32 = vadd.f32 %v3120_v9, %v1730_v25  ;;  %v1752_v7 = vadd.f32 %v3120_v9, %v1729_v42  ;;  %v1767_v37 = vadd.f32 %v3120_v9, %v1744_v2 }
 0x20e   : > { %1798 = vst [vmem:[%s3169_s30 + $0x70] sm:$0xff] %v1782_v6  ;;  %v1769_v27 = vmax.f32 %v1753_v32, 0.0  ;;  %v1768_v28 = vmax.f32 %v1752_v7, 0.0  ;;  %v1783_v15 = vmax.f32 %v1767_v37, 0.0 }
 0x210   : > { %1785 = vst [vmem:[%s3169_s30 + $0x8] sm:$0xff] %v1769_v27  ;;  %1784 = vst [vmem:[%s3169_s30] sm:$0xff] %v1768_v28 }
 0x211   : > { %1799 = vst [vmem:[%s3169_s30 + $0x78] sm:$0xff] %v1783_v15 }
 0x212   : > { %2349 = shalt.err (!%p2346_p2)
}
 0x213   : > { %s2350_s8 = scalar_lea.hbm %s3402_s28, 2048  ;;  %s2354_s21 = scalar_lea.hbm %s3456_s4, 4096 }
 0x214   : > { %p2351_p13 = scmp.ne.s32.totalorder %s3402_s28, %s2350_s8  ;;  %p2355_p4 = scmp.lt.u32.totalorder %s3402_s28, %s3456_s4 }
 0x215   : > { %p2356_p5 = scmp.lt.u32.totalorder %s2354_s21, %s2350_s8  ;;  %p2358_p11 = scmp.lt.u32.totalorder %s2350_s8, %s3402_s28 }
 0x216   : > { %p2352_p6 = pnand %p2351_p13, %p3510_p0 }
 0x217   : > { %p2357_p8 = por %p2356_p5, %p2355_p4 }
 0x218   : > { %p2353_p10 = pneg %p2352_p6 }
 0x219   : > { %p2359_p1 = por %p2358_p11, %p2357_p8 }
 0x21b   : > { %p2360_p3 = pnand %p2359_p1, %p2353_p10 }
 0x21d   : > { %2363 = shalt.err (!%p2360_p3)
}
 0x21e   : > { %s2418_s30 = smov 128   ;;  %s2419_s5 = smov 8  }
 0x21f   : > { %2081 = dma.vmem_to_hbm [thread:$0]  (%p3510_p0), %s3404_s6, 2048, %s3402_s28, %s1801_s19, %s2418_s30, %s2418_s30, %s2419_s5  }
 0x220 PF: > { %s1829_s24 = sand.u32 1, %s2394_s15   ;;  %p3511_p7 = scmp.ne.s32.totalorder %s3464_s22, 0 }
 0x221   : > { %p3512_p9 = scmp.ge.s32.totalorder %s2406_s18, 2  ;;  %s1830_s20 = scalar_lea.sflag [#allocation4], %s1829_s24 }
 0x223   : > { %p2095_p12 = pnand %p3512_p9, %p3511_p7 }
 0x225   : > { %2389 = dma.done.wait (!%p2095_p12), %s1830_s20, 2048  }
 0x226   : > { %2391 = vsyncadd (!%p2095_p12), %s1830_s20, 4294965248  ;;  %p18_p2 = scmp.ge.s32.totalorder %s2555_s9, 4   ;;  %s3513_s15 = smov %s2398_s16 }
 0x227   : > { %s3514_s16 = smov %s2402_s17  ;;  %s3515_s17 = smov %s2571_s14 }
 0x228   : > { %s3516_s18 = smov %s2555_s9  ;;  %20 = sbr.rel (!%p18_p2) target bundleno = 6 (0x6), region = 89 }
 0x22f   :  { %1835 = vsyncpa [#allocation3], 1 }
 0x230   :  { %1837 = vsyncpa [#allocation3 + $0x1], 1 }
 0x231   :  { %1838 = vsyncpa [#allocation6], 1 }
 0x232   :  { %1839 = vsyncpa [#allocation4], 1 }
 0x233   :  { %1841 = vsyncpa [#allocation4 + $0x1], 1 }

</bundles_post_ra>
